<compile_context>
chip_gen: v5e
topology: v5e:2x2
jax: 0.10.0
libtpu: 0.0.40
codegen_flags: <defaults>
</compile_context>

<pallas_src>
import math

import jax
import jax.numpy as jnp
from jax.experimental import pallas as pl
from jax.experimental.pallas import tpu as pltpu


def _pos_embed_kernel(embed_ref, inv_dimt_ref, phase_ref, out_ref, cache_ref):
    # embed_ref:    (3, S_TILE)      z/y/x embedding value per flattened spatial lane
    # inv_dimt_ref: (N, 1)           1 / dim_t per feature row (sublane axis)
    # phase_ref:    (N, 1)           0 or pi/2  (cos(x) = sin(x + pi/2))
    # out_ref:      (1, 3N, S_TILE)  channel-first output block for batch b
    # cache_ref:    (3N, S_TILE)     VMEM scratch holding the batch-invariant slab
    b = pl.program_id(1)
    n = inv_dimt_ref.shape[0]
    s_tile = embed_ref.shape[1]

    # The slab only depends on the spatial tile, never on the batch index: the
    # batch axis is innermost, so recompute only when a new spatial tile starts.
    @pl.when(b == 0)
    def _():
        # Hoist the (N,1) -> (N,S_TILE) broadcasts out of the unrolled loop
        # (JAX does not CSE broadcast_in_dim).
        inv_b = jnp.broadcast_to(inv_dimt_ref[...], (n, s_tile))
        ph_b = jnp.broadcast_to(phase_ref[...], (n, s_tile))
        for c in range(3):  # z, y, x components
            e = jnp.broadcast_to(embed_ref[c:c + 1, :], (n, s_tile))
            cache_ref[c * n:(c + 1) * n, :] = jnp.sin(e * inv_b + ph_b)

    # Every batch step: full-width lane-dense store of the cached slab.
    out_ref[0, :, :] = cache_ref[...]


def _round_up(x, m):
    return ((x + m - 1) // m) * m


def _choose_spatial_tile(s_total, rows, max_block_bytes=8 * 1024 * 1024):
    """Fixed 128-multiple spatial tile.

    Sized so the (rows, tile) f32 output block stays under max_block_bytes
    (v7x VMEM budget: 2x output double-buffer + 1x cache scratch ~= 3 blocks),
    and capped at ~S/2 so the "parallel" spatial grid axis gets >= 2 steps
    whenever the extent allows it (v7x megacore)."""
    budget = max(128, (max_block_bytes // (rows * 4)) // 128 * 128)
    half = max(128, _round_up((s_total + 1) // 2, 128))
    return min(budget, half)


def position_embedding_sine_3d(tensor, num_pos_feats=64, temperature=10000,
                               normalize=False, scale=None):
    """JAX/Pallas equivalent of PositionEmbeddingSine.forward (3D variant)."""
    if scale is not None and normalize is False:
        raise ValueError("normalize should be True if scale is passed")
    if scale is None:
        scale = 2 * math.pi
    assert num_pos_feats % 2 == 0, "num_pos_feats must be even (sin/cos interleave)"

    B, C, D, H, W = tensor.shape
    n = num_pos_feats
    S = D * H * W

    # cumsum of the all-ones not_mask along each axis == (coordinate + 1).
    d_vals = jnp.arange(1, D + 1, dtype=jnp.float32)
    h_vals = jnp.arange(1, H + 1, dtype=jnp.float32)
    w_vals = jnp.arange(1, W + 1, dtype=jnp.float32)
    if normalize:
        # Reproduces the module's exact (quirky) slicing: with an all-ones
        # not_mask those slices reduce to dividing each coordinate's embed
        # value by itself (+ eps), per axis.
        eps = 1e-6
        d_vals = (d_vals - 0.5) / (d_vals + eps) * scale
        h_vals = (h_vals - 0.5) / (h_vals + eps) * scale
        w_vals = (w_vals - 0.5) / (w_vals + eps) * scale

    z_flat = jnp.broadcast_to(d_vals[:, None, None], (D, H, W)).reshape(S)
    y_flat = jnp.broadcast_to(h_vals[None, :, None], (D, H, W)).reshape(S)
    x_flat = jnp.broadcast_to(w_vals[None, None, :], (D, H, W)).reshape(S)
    embed = jnp.stack([z_flat, y_flat, x_flat], axis=0)            # (3, S)

    idx = jnp.arange(n, dtype=jnp.float32)
    dim_t = temperature ** (2.0 * jnp.floor(idx / 2.0) / n)
    inv_dim_t = (1.0 / dim_t).reshape(n, 1)                        # (n, 1)
    phase = ((jnp.arange(n) % 2).astype(jnp.float32)
             * (math.pi / 2.0)).reshape(n, 1)                      # (n, 1)

    # Padded cdiv tiling: lane-dense 128-multiple tiles for any spatial extent.
    s_tile = _choose_spatial_tile(S, 3 * n)
    num_s_tiles = pl.cdiv(S, s_tile)
    S_pad = num_s_tiles * s_tile
    if S_pad != S:
        embed = jnp.pad(embed, ((0, 0), (0, S_pad - S)))

    grid = (num_s_tiles, B)   # batch innermost so the cached slab is reused

    out = pl.pallas_call(
        _pos_embed_kernel,
        out_shape=jax.ShapeDtypeStruct((B, 3 * n, S_pad), jnp.float32),
        grid_spec=pltpu.PrefetchScalarGridSpec(
            num_scalar_prefetch=0,
            grid=grid,
            in_specs=[
                pl.BlockSpec((3, s_tile), lambda s, b: (0, s)),
                pl.BlockSpec((n, 1), lambda s, b: (0, 0)),
                pl.BlockSpec((n, 1), lambda s, b: (0, 0)),
            ],
            out_specs=pl.BlockSpec((1, 3 * n, s_tile), lambda s, b: (b, 0, s)),
            scratch_shapes=[pltpu.VMEM((3 * n, s_tile), jnp.float32)],
        ),
        compiler_params=pltpu.CompilerParams(
            dimension_semantics=("parallel", "arbitrary"),
            vmem_limit_bytes=48 * 1024 * 1024),
    )(embed, inv_dim_t, phase)

    if S_pad != S:
        out = out[:, :, :S]
    # Free contiguous split of the trailing axis -> PyTorch layout
    # (B, 3*num_pos_feats, D, H, W).
    return out.reshape(B, 3 * n, D, H, W)


def _reference(tensor, num_pos_feats=64, temperature=10000,
               normalize=False, scale=None):
    """Pure-JAX reference mirroring the PyTorch forward exactly (incl. quirks)."""
    if scale is None:
        scale = 2 * math.pi
    B, C, D, H, W = tensor.shape
    n = num_pos_feats
    not_mask = jnp.ones((B, D, H, W), dtype=jnp.float32)
    z_embed = jnp.cumsum(not_mask, axis=1)
    y_embed = jnp.cumsum(not_mask, axis=2)
    x_embed = jnp.cumsum(not_mask, axis=3)
    if normalize:
        eps = 1e-6
        # exact indexing as written in the module's forward()
        z_embed = (z_embed - 0.5) / (z_embed[-1:, :, :] + eps) * scale
        y_embed = (y_embed - 0.5) / (y_embed[:, -1:, :] + eps) * scale
        x_embed = (x_embed - 0.5) / (x_embed[:, :, -1:] + eps) * scale
    dim_t = jnp.arange(n, dtype=jnp.float32)
    dim_t = temperature ** (2.0 * jnp.floor(dim_t / 2.0) / n)

    def interleave(p):
        s = jnp.sin(p[..., 0::2])
        c = jnp.cos(p[..., 1::2])
        return jnp.stack((s, c), axis=-1).reshape(p.shape[:-1] + (n,))

    pos_x = interleave(x_embed[..., None] / dim_t)
    pos_y = interleave(y_embed[..., None] / dim_t)
    pos_z = interleave(z_embed[..., None] / dim_t)
    pos = jnp.concatenate((pos_z, pos_y, pos_x), axis=4)
    return jnp.transpose(pos, (0, 4, 1, 2, 3))


if __name__ == "__main__":
    key = jax.random.PRNGKey(0)
    B, C, D, H, W = 2, 4, 4, 8, 16
    num_pos_feats = 16  # must be even (sin/cos interleave)

    x = jax.random.normal(key, (B, C, D, H, W), dtype=jnp.float32)

    # default path (normalize=False)
    pos = jax.block_until_ready(
        position_embedding_sine_3d(x, num_pos_feats=num_pos_feats))
    ref = _reference(x, num_pos_feats=num_pos_feats)
    assert pos.shape == (B, 3 * num_pos_feats, D, H, W), pos.shape
    assert pos.dtype == jnp.float32
    assert jnp.allclose(pos, ref, atol=1e-5, rtol=1e-5), "mismatch (normalize=False)"

    # normalized path
    pos_n = jax.block_until_ready(
        position_embedding_sine_3d(x, num_pos_feats=num_pos_feats, normalize=True))
    ref_n = _reference(x, num_pos_feats=num_pos_feats, normalize=True)
    assert jnp.allclose(pos_n, ref_n, atol=1e-5, rtol=1e-5), "mismatch (normalize=True)"

    # non-128-aligned spatial extent exercises the padded cdiv tiling path
    x_odd = jax.random.normal(key, (2, C, 3, 5, 7), dtype=jnp.float32)
    pos_odd = jax.block_until_ready(
        position_embedding_sine_3d(x_odd, num_pos_feats=num_pos_feats, normalize=True))
    ref_odd = _reference(x_odd, num_pos_feats=num_pos_feats, normalize=True)
    assert jnp.allclose(pos_odd, ref_odd, atol=1e-5, rtol=1e-5), "mismatch (odd shape)"

    print("KERNEL_OK")
</pallas_src>

<mosaic_0001>
module attributes {stable_mosaic.version = 11 : i64} {
  func.func @_pos_embed_kernel(%arg0: i32, %arg1: i32, %arg2: memref<3x256xf32, #tpu.memory_space<vmem>>, %arg3: memref<16x1xf32, #tpu.memory_space<vmem>>, %arg4: memref<16x1xf32, #tpu.memory_space<vmem>>, %arg5: memref<1x48x256xf32, #tpu.memory_space<vmem>>, %arg6: memref<48x256xf32, #tpu.memory_space<vmem>>) attributes {dimension_semantics = [#tpu.dimension_semantics<parallel>, #tpu.dimension_semantics<arbitrary>], iteration_bounds = array<i64: 2, 2>, scalar_prefetch = 0 : i64, scratch_operands = 1 : i64, tpu.core_type = #tpu.core_type<tc>, window_params = [{transform_indices = @transform_0, window_bounds = array<i64: 3, 256>}, {pipeline_mode = #tpu.pipeline_mode<synchronous>, transform_indices = @transform_1, window_bounds = array<i64: 16, 1>}, {pipeline_mode = #tpu.pipeline_mode<synchronous>, transform_indices = @transform_2, window_bounds = array<i64: 16, 1>}, {transform_indices = @transform_3, window_bounds = array<i64: 1, 48, 256>}]} {
    %c0_i32 = arith.constant 0 : i32
    %0 = arith.cmpi eq, %arg1, %c0_i32 : i32
    %1 = arith.extui %0 : i1 to i32
    %c0_i32_0 = arith.constant 0 : i32
    %2 = arith.cmpi ne, %1, %c0_i32_0 : i32
    scf.if %2 {
      %c0_5 = arith.constant 0 : index
      %c0_6 = arith.constant 0 : index
      %7 = vector.load %arg3[%c0_5, %c0_6] : memref<16x1xf32, #tpu.memory_space<vmem>>, vector<16x1xf32>
      %8 = vector.shape_cast %7 : vector<16x1xf32> to vector<16x1xf32>
      %9 = vector.broadcast %8 : vector<16x1xf32> to vector<16x256xf32>
      %c0_7 = arith.constant 0 : index
      %c0_8 = arith.constant 0 : index
      %10 = vector.load %arg4[%c0_7, %c0_8] : memref<16x1xf32, #tpu.memory_space<vmem>>, vector<16x1xf32>
      %11 = vector.shape_cast %10 : vector<16x1xf32> to vector<16x1xf32>
      %12 = vector.broadcast %11 : vector<16x1xf32> to vector<16x256xf32>
      %c0_9 = arith.constant 0 : index
      %c0_10 = arith.constant 0 : index
      %13 = vector.load %arg2[%c0_9, %c0_10] : memref<3x256xf32, #tpu.memory_space<vmem>>, vector<1x256xf32>
      %14 = vector.shape_cast %13 : vector<1x256xf32> to vector<1x256xf32>
      %15 = vector.broadcast %14 : vector<1x256xf32> to vector<16x256xf32>
      %16 = arith.mulf %15, %9 : vector<16x256xf32>
      %17 = arith.addf %16, %12 : vector<16x256xf32>
      %18 = math.sin %17 : vector<16x256xf32>
      %c0_11 = arith.constant 0 : index
      %c0_12 = arith.constant 0 : index
      %19 = vector.load %arg6[%c0_11, %c0_12] : memref<48x256xf32, #tpu.memory_space<vmem>>, vector<16x256xf32>
      tpu.vector_store %arg6[%c0_11, %c0_12], %18 {strides = array<i32>} : memref<48x256xf32, #tpu.memory_space<vmem>>, vector<16x256xf32>,
      %c1 = arith.constant 1 : index
      %c0_13 = arith.constant 0 : index
      %20 = vector.load %arg2[%c1, %c0_13] : memref<3x256xf32, #tpu.memory_space<vmem>>, vector<1x256xf32>
      %21 = vector.shape_cast %20 : vector<1x256xf32> to vector<1x256xf32>
      %22 = vector.broadcast %21 : vector<1x256xf32> to vector<16x256xf32>
      %23 = arith.mulf %22, %9 : vector<16x256xf32>
      %24 = arith.addf %23, %12 : vector<16x256xf32>
      %25 = math.sin %24 : vector<16x256xf32>
      %c16 = arith.constant 16 : index
      %c0_14 = arith.constant 0 : index
      %26 = vector.load %arg6[%c16, %c0_14] : memref<48x256xf32, #tpu.memory_space<vmem>>, vector<16x256xf32>
      tpu.vector_store %arg6[%c16, %c0_14], %25 {strides = array<i32>} : memref<48x256xf32, #tpu.memory_space<vmem>>, vector<16x256xf32>,
      %c2 = arith.constant 2 : index
      %c0_15 = arith.constant 0 : index
      %27 = vector.load %arg2[%c2, %c0_15] : memref<3x256xf32, #tpu.memory_space<vmem>>, vector<1x256xf32>
      %28 = vector.shape_cast %27 : vector<1x256xf32> to vector<1x256xf32>
      %29 = vector.broadcast %28 : vector<1x256xf32> to vector<16x256xf32>
      %30 = arith.mulf %29, %9 : vector<16x256xf32>
      %31 = arith.addf %30, %12 : vector<16x256xf32>
      %32 = math.sin %31 : vector<16x256xf32>
      %c32 = arith.constant 32 : index
      %c0_16 = arith.constant 0 : index
      %33 = vector.load %arg6[%c32, %c0_16] : memref<48x256xf32, #tpu.memory_space<vmem>>, vector<16x256xf32>
      tpu.vector_store %arg6[%c32, %c0_16], %32 {strides = array<i32>} : memref<48x256xf32, #tpu.memory_space<vmem>>, vector<16x256xf32>,
    } else {
    }
    %c0 = arith.constant 0 : index
    %c0_1 = arith.constant 0 : index
    %3 = vector.load %arg6[%c0, %c0_1] : memref<48x256xf32, #tpu.memory_space<vmem>>, vector<48x256xf32>
    %c0_2 = arith.constant 0 : index
    %c0_3 = arith.constant 0 : index
    %c0_4 = arith.constant 0 : index
    %4 = vector.load %arg5[%c0_2, %c0_3, %c0_4] : memref<1x48x256xf32, #tpu.memory_space<vmem>>, vector<1x48x256xf32>
    %5 = vector.shape_cast %4 : vector<1x48x256xf32> to vector<48x256xf32>
    %6 = vector.shape_cast %3 : vector<48x256xf32> to vector<1x48x256xf32>
    tpu.vector_store %arg5[%c0_2, %c0_3, %c0_4], %6 {strides = array<i32>} : memref<1x48x256xf32, #tpu.memory_space<vmem>>, vector<1x48x256xf32>,
    return
  }
  func.func @transform_0(%arg0: i32, %arg1: i32) -> (i32, i32) {
    %c0_i32 = arith.constant 0 : i32
    %c0_i32_0 = arith.constant 0 : i32
    return %c0_i32, %arg0 : i32, i32
  }
  func.func @transform_1(%arg0: i32, %arg1: i32) -> (i32, i32) {
    %c0_i32 = arith.constant 0 : i32
    %c0_i32_0 = arith.constant 0 : i32
    %c0_i32_1 = arith.constant 0 : i32
    return %c0_i32, %c0_i32_0 : i32, i32
  }
  func.func @transform_2(%arg0: i32, %arg1: i32) -> (i32, i32) {
    %c0_i32 = arith.constant 0 : i32
    %c0_i32_0 = arith.constant 0 : i32
    %c0_i32_1 = arith.constant 0 : i32
    return %c0_i32, %c0_i32_0 : i32, i32
  }
  func.func @transform_3(%arg0: i32, %arg1: i32) -> (i32, i32, i32) {
    %c0_i32 = arith.constant 0 : i32
    %c0_i32_0 = arith.constant 0 : i32
    return %arg1, %c0_i32, %arg0 : i32, i32, i32
  }
}

</mosaic_0001>

<bundles_post_ra>
// kernel: tpu_custom_call.1
= control target key start
LH: loop header
LB: loop body
LE: loop exit
PB: predicated region body
PF: predicated region fallthrough
CT: control target
= control target key end

     0   :  { %8 = vsyncpa [#allocation4], 0  ;;  %s4024_s0 = inlined_call_operand.vmem [shape: f32[3,512], index: 0, kind: input, shape index: {}]   ;;  %s4025_s1 = inlined_call_operand.vmem [shape: f32[16,1], index: 1, kind: input, shape index: {}]   ;;  %s4026_s2 = inlined_call_operand.vmem [shape: f32[16,1], index: 2, kind: input, shape index: {}]   ;;  %s4027_s3 = inlined_call_operand.hbm [shape: f32[2,48,512], index: 3, kind: output, shape index: {}]  }
   0x1   :  { %10 = vsyncpa [#allocation4 + $0x1], 0  ;;  %s2509_s12 = smov 0   ;;  %s2511_s13 = smov 0  }
   0x2   :  { %s2513_s14 = smov 0   ;;  %s2515_s15 = smov 0  }
   0x3   :  { %s2517_s16 = smov 0   ;;  %s2519_s17 = smov 0  }
   0x4   :  { %s2521_s18 = smov 0   ;;  %s2523_s19 = smov 0  }
   0x5 LB: > { %s2248_s20 = sadd.s32 4294967295, %s2477_s19   ;;  %s2249_s21 = sadd.s32 4294967294, %s2477_s19   ;;  %s2477_s19 = sphi %s2523_s19, %s16_s19   ;;  %s2473_s18 = sphi %s2521_s18, %s4056_s18   ;;  %s2469_s17 = sphi %s2519_s17, %s4055_s17   ;;  %s2465_s16 = sphi %s2517_s16, %s4054_s16   ;;  %s2461_s15 = sphi %s2515_s15, %s4053_s15   ;;  %s2457_s14 = sphi %s2513_s14, %s4052_s14   ;;  %s2453_s13 = sphi %s2511_s13, %s4051_s13   ;;  %s2449_s12 = sphi %s2509_s12, %s4050_s12  }
   0x6   : > { %s25_s22 = sadd.s32 1, %s2469_s17  ;;  %s28_s23 = sadd.s32 1, %s2473_s18 }
   0x7   : > { %p26_p0 = scmp.ge.s32.totalorder %s25_s22, 2  ;;  %p115_p1 = scmp.ne.s32.totalorder %s2457_s14, %s2453_s13 }
   0x8   : > { %p116_p2 = scmp.eq.s32.totalorder %s2248_s20, 3  ;;  %p121_p5 = scmp.ne.s32.totalorder %s2453_s13, %s2449_s12 }
   0x9   : > { %s4058_s22 = smov (%p26_p0, %s25_s22), 0  ;;  %s4060_s23 = smov (!%p26_p0, %s28_s23), %s2473_s18 }
   0xa   : > { %s100_s24 = ssub.s32 %s2469_s17, %s4058_s22  ;;  %p2560_p3 = por %p116_p2, %p115_p1 }
   0xb   : > { %p30_p4 = scmp.ge.s32.totalorder %s4060_s23, 2  ;;  %p122_p6 = scmp.eq.s32.totalorder %s2249_s21, 3 }
   0xc   : > { %p2252_p7 = scmp.ge.s32.totalorder %s2477_s19, 1  ;;  %p155_p9 = scmp.lt.s32.totalorder %s2477_s19, 5 }
   0xd   : > { %s4062_s23 = smov (%p30_p4, %s4060_s23), 0  ;;  %p2569_p8 = por %p122_p6, %p121_p5 }
   0xe   : > { %s101_s27 = ssub.s32 %s2473_s18, %s4062_s23  ;;  %s105_s28 = sadd.s32 1, %s2457_s14 }
   0xf   : > { %s102_s29 = sor.u32 %s101_s27, %s100_s24  ;;  %p156_p10 = pnand %p2252_p7, %p155_p9 }
  0x10   : > { %p103_p11 = scmp.eq.s32.totalorder %s102_s29, 0  ;;  %s176_s4 = sand.u32 (!%p156_p10), 1, %s2453_s13  }
  0x11   : > { %159 = sbr.rel (%p156_p10) target bundleno = 662 (0x296), region = 32  ;;  %s2582_s5 = sshll.u32 (!%p156_p10), %s2465_s16, 1 }
  0x12   : > { %s2578_s30 = scalar_select %p103_p11, %s2457_s14, %s105_s28  }
  0x13   : > { %s2298_s6 = smul.u32 (!%p156_p10), 96, %s176_s4  ;;  %p180_p12 = scmp.lt.s32.totalorder (!%p156_p10), %s2582_s5, 3 }
  0x14   : > { %p2255_p13 = scmp.ne.s32.totalorder (!%p156_p10), %s2461_s15, 0 }
  0x15   : > { %s2593_s20 = scalar_lea.vmem (!%p156_p10), [#allocation3], %s2298_s6 }
  0x16   : > { %s181_s7 = scalar_select %p180_p12, %s2582_s5, 3 }
  0x17   : > { %189 = sbr.rel (%p2255_p13) target bundleno = 642 (0x282), region = 36 }
  0x18   : > { %s2254_s8 = sshll.u32 %s181_s7, 2 }
  0x19   : > { %s2591_s11 = scalar_lea.vmem %s4024_s0, %s2254_s8 }
  0x1c   : > { %v202_v0 = vld [vmem:[%s4026_s2] sm:$0xff]  ;;  %v2479_v2 = vmov 0   ;;  %v203_v3 = vld [vmem:[%s4026_s2 + $0x8] sm:$0xff]  ;;  %v2480_v42 = vmov 683565275  }
  0x1d   : > { %v190_v1 = vld [vmem:[%s4025_s1] sm:$0xff]  ;;  %2382 = vset.pattern.permute.xlu1 %v2479_v2  ;;  %2381 = vset.pattern.permute.xlu0 %v2479_v2  ;;  %v191_v4 = vld [vmem:[%s4025_s1 + $0x8] sm:$0xff]  ;;  %v2481_v44 = vmov 2475754826   ;;  %v2482_v48 = vmov 2131351028  }
  0x1e   : > { %206 = vperm.xlu1 %2382, %v202_v0   ;;  %194 = vperm.xlu0 %2381, %v190_v1   ;;  %v2611_v5 = vld [vmem:[%s2591_s11] ss:$4 sm:$0x3]  ;;  %v2483_v51 = vmov 2102212464  }
  0x1f   : > { %v216_v6 = vperm.slane %v2611_v5, 0  ;;  %v217_v7 = vperm.slane %v2611_v5, 1  ;;  %v2484_v54 = vmov 920167782   ;;  %v2485_v57 = vmov 1326507024  }
  0x26   : > { %211 = vperm.xlu1 %2382, %v203_v3   ;;  %199 = vperm.xlu0 %2381, %v191_v4  }
  0x90   : > { %v2615_v8 = vpop.permute.xlu0 %194  ;;  %v2621_v11 = vpop.permute.xlu1 %206 }
  0x91   : > { %v220_v9 = vmul.f32 %v216_v6, %v2615_v8  ;;  %v221_v10 = vmul.f32 %v217_v7, %v2615_v8 }
  0x93   : > { %v2624_v12 = vadd.f32 %v220_v9, %v2621_v11  ;;  %v2627_v13 = vadd.f32 %v221_v10, %v2621_v11 }
  0x95   : > { %v228_v14 = vand.u32 2147483647, %v2624_v12  ;;  %v231_v15 = vand.u32 2139095040, %v2624_v12  ;;  %v383_v16 = vand.u32 2147483647, %v2627_v13  ;;  %v386_v17 = vand.u32 2139095040, %v2627_v13 }
  0x97   : > { %v232_v18 = vshrl.u32 %v231_v15, 23  ;;  %v235_v19 = vand.u32 8388607, %v228_v14  ;;  %v387_v20 = vshrl.u32 %v386_v17, 23  ;;  %v390_v21 = vand.u32 8388607, %v383_v16 }
  0x98   : > { %v2637_v22 = vpop.permute.xlu0 %199  ;;  %v2644_v33 = vpop.permute.xlu1 %211 }
  0x99   : > { %v2256_v23 = vadd.s32 4294967169, %v232_v18  ;;  %v236_v24 = vor.u32 8388608, %v235_v19  ;;  %v2259_v25 = vadd.s32 4294967169, %v387_v20  ;;  %v391_v26 = vor.u32 8388608, %v390_v21 }
  0x9a   : > { %v222_v28 = vmul.f32 %v216_v6, %v2637_v22 }
  0x9b   : > { %v238_v27 = vadd.s32 1, %v2256_v23  ;;  %v393_v29 = vadd.s32 1, %v2259_v25  ;;  %v2640_v30 = vshll.u32 %v236_v24, 8  ;;  %v2642_v32 = vshll.u32 %v391_v26, 8 }
  0x9c   : > { %v2647_v36 = vadd.f32 %v222_v28, %v2644_v33 }
  0x9d   : > { %vm239_vm0 = vcmp.gt.s32.totalorder %v238_v27, 0  ;;  %vm394_vm1 = vcmp.gt.s32.totalorder %v393_v29, 0  ;;  %v2650_v38 = vand.u32 65535, %v2640_v30  ;;  %v2653_v39 = vshrl.u32 %v2640_v30, 16 }
  0x9e   : > { %v240_v31 = vsel %vm239_vm0, %v238_v27, 0  ;;  %v395_v35 = vsel %vm394_vm1, %v393_v29, 0  ;;  %v2662_v46 = vand.u32 65535, %v2642_v32  ;;  %vm230_vm0 = vcmp.lt.s32.totalorder %v2624_v12, 0 }
  0x9f   : > { %v242_v34 = vand.u32 31, %v240_v31  ;;  %v2655_v40 = vand.u32 31, %v395_v35  ;;  %v2657_v41 = vshrl.u32 %v240_v31, 5 }
  0xa1   : > { %v243_v37 = vsub.s32 32, %v242_v34  ;;  %v245_v43 = vshll.u32 %v2480_v42, %v242_v34  ;;  %v248_v45 = vshll.u32 %v2481_v44, %v242_v34  ;;  %v251_v50 = vshll.u32 %v2482_v48, %v242_v34 }
  0xa2   : > { %v254_v53 = vshll.u32 %v2483_v51, %v242_v34  ;;  %v257_v56 = vshll.u32 %v2484_v54, %v242_v34  ;;  %v2673_v62 = vsub.s32 32, %v2655_v40  ;;  %vm260_vm2 = vcmp.lt.s32.totalorder %v2657_v41, 1 }
  0xa3   : > { %v246_v47 = vshrl.u32 %v2481_v44, %v243_v37  ;;  %v249_v49 = vshrl.u32 %v2482_v48, %v243_v37  ;;  %v252_v52 = vshrl.u32 %v2483_v51, %v243_v37  ;;  %v255_v55 = vshrl.u32 %v2484_v54, %v243_v37 }
  0xa4   : > { %v258_v58 = vshrl.u32 %v2485_v57, %v243_v37  ;;  %vm261_vm3 = vcmp.lt.s32.totalorder %v2657_v41, 2  ;;  %v244_v1 = vshrl.u32 %v2480_v42, %v243_v37  ;;  %vm263_vm4 = vcmp.lt.s32.totalorder %v2657_v41, 4 }
  0xa5   : > { %v247_v59 = vor.u32 %v246_v47, %v245_v43  ;;  %v250_v60 = vor.u32 %v249_v49, %v248_v45  ;;  %v253_v61 = vor.u32 %v252_v52, %v251_v50  ;;  %v256_v63 = vor.u32 %v255_v55, %v254_v53 }
  0xa6   : > { %v259_v0 = vor.u32 %v258_v58, %v257_v56  ;;  %vm262_vm5 = vcmp.lt.s32.totalorder %v2657_v41, 3  ;;  %v400_v10 = vshll.u32 %v2480_v42, %v2655_v40  ;;  %v401_v19 = vshrl.u32 %v2481_v44, %v2673_v62 }
  0xa7   : > { %v268_v3 = vsel %vm260_vm2, %v247_v59, %v250_v60  ;;  %v272_v4 = vsel %vm260_vm2, %v250_v60, %v253_v61  ;;  %v269_v6 = vsel %vm263_vm4, %v256_v63, 920167782  ;;  %v265_v15 = vsel %vm263_vm4, %v253_v61, 2102212464 }
  0xa8   : > { %v273_v9 = vsel %vm263_vm4, %v259_v0, 1326507024  ;;  %v270_v17 = vsel %vm262_vm5, %v253_v61, %v269_v6  ;;  %v403_v23 = vshll.u32 %v2481_v44, %v2655_v40  ;;  %v404_v24 = vshrl.u32 %v2482_v48, %v2673_v62 }
  0xa9   : > { %v274_v18 = vsel %vm262_vm5, %v256_v63, %v273_v9  ;;  %v271_v20 = vsel %vm261_vm3, %v268_v3, %v270_v17  ;;  %v264_v29 = vsel %vm260_vm2, %v244_v1, %v247_v59  ;;  %v266_v31 = vsel %vm262_vm5, %v250_v60, %v265_v15 }
  0xaa   : > { %v275_v21 = vsel %vm261_vm3, %v272_v4, %v274_v18  ;;  %v301_v27 = vand.u32 65535, %v271_v20  ;;  %v302_v28 = vshrl.u32 %v271_v20, 16  ;;  %v2704_v34 = vshrl.u32 %v395_v35, 5 }
  0xab   : > { %v279_v25 = vand.u32 65535, %v275_v21  ;;  %v280_v26 = vshrl.u32 %v275_v21, 16  ;;  %v2706_v37 = vor.u32 %v401_v19, %v400_v10  ;;  %v2710_v47 = vor.u32 %v404_v24, %v403_v23 }
  0xac   : > { %v407_v49 = vshrl.u32 %v2483_v51, %v2673_v62  ;;  %v304_v52 = vmul.u32 %v302_v28, %v2650_v38  ;;  %v305_v53 = vmul.u32 %v301_v27, %v2653_v39  ;;  %v406_v35 = vshll.u32 %v2482_v48, %v2655_v40 }
  0xad   : > { %v282_v43 = vmul.u32 %v280_v26, %v2650_v38  ;;  %v283_v45 = vmul.u32 %v279_v25, %v2653_v39  ;;  %v281_v50 = vmul.u32 %v279_v25, %v2650_v38  ;;  %v284_v55 = vmul.u32 %v280_v26, %v2653_v39 }
  0xae   : > { %v303_v58 = vmul.u32 %v301_v27, %v2650_v38  ;;  %v306_v59 = vmul.u32 %v302_v28, %v2653_v39  ;;  %v307_v0 = vshll.u32 %v304_v52, 16  ;;  %v309_v3 = vshll.u32 %v305_v53, 16 }
  0xaf   : > { %v285_v56 = vshll.u32 %v282_v43, 16  ;;  %v286_v60 = vshrl.u32 %v282_v43, 16  ;;  %v287_v61 = vshll.u32 %v283_v45, 16  ;;  %v288_v63 = vshrl.u32 %v283_v45, 16 }
  0xb0   : > { %v408_v4 = vor.u32 %v407_v49, %v406_v35  ;;  %vm311_vm7 = vc.u32 %v303_v58, %v307_v0  ;;  %v313_v9 = vadd.s32 %v307_v0, %v303_v58  ;;  %v410_v10 = vshrl.u32 %v2484_v54, %v2673_v62 }
  0xb1   : > { %vm289_vm6 = vc.u32 %v281_v50, %v285_v56  ;;  %v291_v1 = vadd.s32 %v285_v56, %v281_v50  ;;  %v312_v38 = vsel %vm311_vm7, 1, %v2479_v2  ;;  %v409_v39 = vshll.u32 %v2483_v51, %v2655_v40 }
  0xb2   : > { %v290_v6 = vsel %vm289_vm6, 1, %v2479_v2  ;;  %v314_v18 = vadd.s32 %v312_v38, %v306_v59  ;;  %vm315_vm9 = vc.u32 %v313_v9, %v309_v3  ;;  %v412_v19 = vshll.u32 %v2484_v54, %v2655_v40 }
  0xb3   : > { %v292_v15 = vadd.s32 %v290_v6, %v284_v55  ;;  %vm293_vm8 = vc.u32 %v291_v1, %v287_v61  ;;  %v316_v21 = vsel %vm315_vm9, 1, %v2479_v2  ;;  %v411_v23 = vor.u32 %v410_v10, %v409_v39 }
  0xb4   : > { %v294_v17 = vsel %vm293_vm8, 1, %v2479_v2  ;;  %v413_v24 = vshrl.u32 %v2485_v57, %v2673_v62  ;;  %v308_v25 = vshrl.u32 %v304_v52, 16  ;;  %v310_v26 = vshrl.u32 %v305_v53, 16 }
  0xb5   : > { %v296_v20 = vadd.s32 %v294_v17, %v292_v15  ;;  %v2734_v27 = vadd.s32 %v313_v9, %v309_v3  ;;  %v318_v28 = vadd.s32 %v316_v21, %v314_v18  ;;  %vm415_vm10 = vcmp.lt.s32.totalorder %v2704_v34, 1 }
  0xb6   : > { %v414_v45 = vor.u32 %v413_v24, %v412_v19  ;;  %vm418_vm11 = vcmp.lt.s32.totalorder %v2704_v34, 4  ;;  %vm417_vm12 = vcmp.lt.s32.totalorder %v2704_v34, 3  ;;  %v423_v40 = vsel %vm415_vm10, %v2706_v37, %v2710_v47 }
  0xb7   : > { %v297_v43 = vadd.s32 %v296_v20, %v286_v60  ;;  %v319_v49 = vadd.s32 %v318_v28, %v308_v25  ;;  %v424_v50 = vsel %vm418_vm11, %v411_v23, 920167782  ;;  %vm416_vm13 = vcmp.lt.s32.totalorder %v2704_v34, 2 }
  0xb8   : > { %v425_v53 = vsel %vm417_vm12, %v408_v4, %v424_v50  ;;  %v427_v35 = vsel %vm415_vm10, %v2710_v47, %v408_v4  ;;  %v267_v55 = vsel %vm261_vm3, %v264_v29, %v266_v31  ;;  %v428_v59 = vsel %vm418_vm11, %v414_v45, 1326507024 }
  0xb9   : > { %v2745_v52 = vadd.s32 %v297_v43, %v288_v63  ;;  %v320_v56 = vadd.s32 %v319_v49, %v310_v26  ;;  %v426_v58 = vsel %vm416_vm13, %v423_v40, %v425_v53  ;;  %v429_v60 = vsel %vm417_vm12, %v411_v23, %v428_v59 }
  0xba   : > { %v433_v61 = vshrl.u32 %v2642_v32, 16  ;;  %v456_v63 = vand.u32 65535, %v426_v58  ;;  %v430_v41 = vsel %vm416_vm13, %v427_v35, %v429_v60  ;;  %v457_v29 = vshrl.u32 %v426_v58, 16 }
  0xbb   : > { %vm323_vm14 = vc.u32 %v2745_v52, %v2734_v27  ;;  %v324_v0 = vadd.s32 1, %v320_v56  ;;  %v541_v31 = vand.u32 2139095040, %v2647_v36  ;;  %v321_v1 = vmul.u32 %v2640_v30, %v267_v55 }
  0xbc   : > { %v434_v3 = vand.u32 65535, %v430_v41  ;;  %v435_v6 = vshrl.u32 %v430_v41, 16  ;;  %v399_v10 = vshrl.u32 %v2480_v42, %v2673_v62  ;;  %v459_v15 = vmul.u32 %v457_v29, %v2662_v46 }
  0xbd   : > { %v325_v9 = vsel %vm323_vm14, %v324_v0, %v320_v56  ;;  %v460_v38 = vmul.u32 %v456_v63, %v433_v61  ;;  %v420_v17 = vsel %vm418_vm11, %v408_v4, 2102212464  ;;  %v458_v20 = vmul.u32 %v456_v63, %v2662_v46 }
  0xbe   : > { %v326_v39 = vadd.s32 %v325_v9, %v321_v1  ;;  %v437_v18 = vmul.u32 %v435_v6, %v2662_v46  ;;  %v438_v19 = vmul.u32 %v434_v3, %v433_v61  ;;  %v461_v21 = vmul.u32 %v457_v29, %v433_v61 }
  0xbf   : > { %v462_v30 = vshll.u32 %v459_v15, 16  ;;  %v542_v23 = vshrl.u32 %v541_v31, 23  ;;  %v436_v25 = vmul.u32 %v434_v3, %v2662_v46  ;;  %v439_v26 = vmul.u32 %v435_v6, %v433_v61 }
  0xc0   : > { %v327_v24 = vadd.s32 536870912, %v326_v39  ;;  %v440_v62 = vshll.u32 %v437_v18, 16  ;;  %v442_v28 = vshll.u32 %v438_v19, 16  ;;  %v464_v43 = vshll.u32 %v460_v38, 16 }
  0xc1   : > { %vm466_vm15 = vc.u32 %v458_v20, %v462_v30  ;;  %v468_v45 = vadd.s32 %v462_v30, %v458_v20  ;;  %v419_v50 = vsel %vm415_vm10, %v399_v10, %v2706_v37  ;;  %v421_v55 = vsel %vm417_vm12, %v2710_v47, %v420_v17 }
  0xc2   : > { %v328_v4 = vshrl.u32 %v327_v24, 30  ;;  %vm444_vm1 = vc.u32 %v436_v25, %v440_v62  ;;  %v446_v49 = vadd.s32 %v440_v62, %v436_v25  ;;  %v467_v40 = vsel %vm466_vm15, 1, %v2479_v2 }
  0xc3   : > { %v445_v53 = vsel %vm444_vm1, 1, %v2479_v2  ;;  %v469_v46 = vadd.s32 %v467_v40, %v461_v21  ;;  %vm470_vm2 = vc.u32 %v468_v45, %v464_v43  ;;  %v538_v60 = vand.u32 2147483647, %v2647_v36 }
  0xc4   : > { %v329_v35 = vshll.u32 %v328_v4, 30  ;;  %v447_v56 = vadd.s32 %v445_v53, %v439_v26  ;;  %vm448_vm3 = vc.u32 %v446_v49, %v442_v28  ;;  %v471_v59 = vsel %vm470_vm2, 1, %v2479_v2 }
  0xc5   : > { %v449_v58 = vsel %vm448_vm3, 1, %v2479_v2  ;;  %v2262_v61 = vadd.s32 4294967169, %v542_v23  ;;  %v441_v37 = vshrl.u32 %v437_v18, 16  ;;  %v473_v41 = vadd.s32 %v471_v59, %v469_v46 }
  0xc6   : > { %v330_v63 = vsub.s32 %v326_v39, %v329_v35  ;;  %v451_v0 = vadd.s32 %v449_v58, %v447_v56  ;;  %v352_v29 = vsub.s32 4, %v328_v4  ;;  %v422_v31 = vsel %vm416_vm13, %v419_v50, %v421_v55 }
  0xc7   : > { %v463_v1 = vshrl.u32 %v459_v15, 16  ;;  %v548_v3 = vadd.s32 1, %v2262_v61  ;;  %v443_v6 = vshrl.u32 %v438_v19, 16  ;;  %v465_v10 = vshrl.u32 %v460_v38, 16 }
  0xc8   : > { %vm331_vm4 = vcmp.lt.s32.totalorder %v330_v63, 0  ;;  %v332_v47 = vsub.s32 0, %v330_v63  ;;  %v452_v9 = vadd.s32 %v451_v0, %v441_v37  ;;  %v2790_v17 = vadd.s32 %v468_v45, %v464_v43 }
  0xc9   : > { %v474_v20 = vadd.s32 %v473_v41, %v463_v1  ;;  %vm549_vm5 = vcmp.gt.s32.totalorder %v548_v3, 0  ;;  %v545_v18 = vand.u32 8388607, %v538_v60  ;;  %v353_v15 = vsel %vm230_vm0, %v352_v29, %v328_v4 }
  0xca   : > { %v333_v21 = vsel %vm331_vm4, %v332_v47, %v330_v63  ;;  %v2792_v39 = vadd.s32 %v452_v9, %v443_v6  ;;  %v550_v30 = vsel %vm549_vm5, %v548_v3, 0  ;;  %v223_v38 = vmul.f32 %v217_v7, %v2637_v22 }
  0xcb   : > { %v334_v34 = vclz %v333_v21  ;;  %v475_v23 = vadd.s32 %v474_v20, %v465_v10  ;;  %v552_v24 = vand.u32 31, %v550_v30  ;;  %vm2803_vm6 = vcmp.le.f32.partialorder %v228_v14, 0.7853982 }
  0xcc   : > { %vm478_vm7 = vc.u32 %v2792_v39, %v2790_v17  ;;  %v322_v28 = vadd.s32 %v2734_v27, %v2745_v52  ;;  %v355_v43 = vsel %vm2803_vm6, 0, %v353_v15  ;;  %v476_v5 = vmul.u32 %v2642_v32, %v422_v31 }
  0xcd   : > { %v2257_v25 = vadd.s32 4294967294, %v334_v34  ;;  %v479_v26 = vadd.s32 1, %v475_v23  ;;  %v553_v62 = vsub.s32 32, %v552_v24  ;;  %v546_v7 = vor.u32 8388608, %v545_v18 }
  0xce   : > { %v2814_v45 = vshrl.u32 %v550_v30, 5  ;;  %v555_v4 = vshll.u32 %v2480_v42, %v552_v24  ;;  %v558_v52 = vshll.u32 %v2481_v44, %v552_v24  ;;  %v561_v55 = vshll.u32 %v2482_v48, %v552_v24 }
  0xcf   : > { %vm2258_vm8 = vcmp.lt.s32.totalorder %v2257_v25, 0  ;;  %v480_v14 = vsel %vm478_vm7, %v479_v26, %v475_v23  ;;  %v556_v50 = vshrl.u32 %v2481_v44, %v553_v62  ;;  %v559_v53 = vshrl.u32 %v2482_v48, %v553_v62 }
  0xd0   : > { %v337_v49 = vsel %vm2258_vm8, 0, %v2257_v25  ;;  %v481_v40 = vadd.s32 %v480_v14, %v476_v5  ;;  %v562_v35 = vshrl.u32 %v2483_v51, %v553_v62  ;;  %v564_v56 = vshll.u32 %v2483_v51, %v552_v24 }
  0xd1   : > { %v338_v46 = vsub.s32 32, %v337_v49  ;;  %v342_v27 = vsub.s32 4294967266, %v337_v49  ;;  %v565_v58 = vshrl.u32 %v2484_v54, %v553_v62  ;;  %v339_v59 = vshll.u32 %v330_v63, %v337_v49 }
  0xd2   : > { %v482_v32 = vadd.s32 536870912, %v481_v40  ;;  %v568_v0 = vshrl.u32 %v2485_v57, %v553_v62  ;;  %v557_v29 = vor.u32 %v556_v50, %v555_v4  ;;  %v2825_v31 = vor.u32 %v559_v53, %v558_v52 }
  0xd3   : > { %v340_v61 = vshrl.u32 %v322_v28, %v338_v46  ;;  %v343_v37 = vadd.s32 127, %v342_v27  ;;  %v566_v1 = vor.u32 %v565_v58, %v564_v56  ;;  %v563_v6 = vor.u32 %v562_v35, %v561_v55 }
  0xd4   : > { %v483_v41 = vshrl.u32 %v482_v32, 30  ;;  %v567_v9 = vshll.u32 %v2484_v54, %v552_v24  ;;  %v2829_v10 = vadd.f32 %v223_v38, %v2644_v33  ;;  %v372_v20 = vadd.s32 3, %v355_v43 }
  0xd5   : > { %v341_v3 = vor.u32 %v340_v61, %v339_v59  ;;  %v344_v47 = vshll.u32 %v343_v37, 23  ;;  %vm570_vm9 = vcmp.lt.s32.totalorder %v2814_v45, 1  ;;  %vm573_vm10 = vcmp.lt.s32.totalorder %v2814_v45, 4 }
  0xd6   : > { %v484_v21 = vshll.u32 %v483_v41, 30  ;;  %v569_v18 = vor.u32 %v568_v0, %v567_v9  ;;  %vm572_vm11 = vcmp.lt.s32.totalorder %v2814_v45, 3  ;;  %v578_v34 = vsel %vm570_vm9, %v557_v29, %v2825_v31 }
  0xd7   : > { %v345_v63 = vor.u32 4788187, %v344_v47  ;;  %v579_v15 = vsel %vm573_vm10, %v566_v1, 920167782  ;;  %v348_v24 = vcvt.s32.f32 %v341_v3  ;;  %vm385_vm12 = vcmp.lt.s32.totalorder %v2627_v13, 0 }
  0xd8   : > { %v2833_v30 = vsub.s32 %v481_v40, %v484_v21  ;;  %v580_v38 = vsel %vm572_vm11, %v563_v6, %v579_v15  ;;  %v2844_v25 = vshll.u32 %v546_v7, 8  ;;  %vm571_vm14 = vcmp.lt.s32.totalorder %v2814_v45, 2 }
  0xd9   : > { %v346_v23 = vand.u32 2147483647, %v345_v63  ;;  %v693_v28 = vand.u32 2147483647, %v2829_v10  ;;  %v2852_v5 = vsel %vm571_vm14, %v578_v34, %v580_v38  ;;  %v582_v14 = vsel %vm570_vm9, %v2825_v31, %v563_v6 }
  0xda   : > { %vm486_vm13 = vcmp.lt.s32.totalorder %v2833_v30, 0  ;;  %v487_v26 = vsub.s32 0, %v2833_v30  ;;  %v583_v7 = vsel %vm573_vm10, %v569_v18, 1326507024  ;;  %v2859_v4 = vand.u32 3, %v372_v20 }
  0xdb   : > { %v349_v43 = vmul.f32 %v348_v24, %v346_v23  ;;  %v554_v40 = vshrl.u32 %v2480_v42, %v553_v62  ;;  %v584_v50 = vsel %vm572_vm11, %v566_v1, %v583_v7  ;;  %v507_v27 = vsub.s32 4, %v483_v41 }
  0xdc   : > { %v488_v49 = vsel %vm486_vm13, %v487_v26, %v2833_v30  ;;  %v585_v52 = vsel %vm571_vm14, %v582_v14, %v584_v50  ;;  %v587_v35 = vand.u32 65535, %v2844_v25  ;;  %v588_v32 = vshrl.u32 %v2844_v25, 16 }
  0xdd   : > { %v350_v53 = vxor.u32 2147483648, %v349_v43  ;;  %v489_v46 = vclz %v488_v49  ;;  %v589_v55 = vand.u32 65535, %v585_v52  ;;  %v611_v56 = vand.u32 65535, %v2852_v5 }
  0xde   : > { %v590_v59 = vshrl.u32 %v585_v52, 16  ;;  %v612_v61 = vshrl.u32 %v2852_v5, 16  ;;  %v477_v0 = vadd.s32 %v2790_v17, %v2792_v39  ;;  %v2882_v1 = vsel %vm570_vm9, %v554_v40, %v557_v29 }
  0xdf   : > { %v351_v58 = vsel %vm230_vm0, %v350_v53, %v349_v43  ;;  %v2260_v62 = vadd.s32 4294967294, %v489_v46  ;;  %v2884_v3 = vmul.u32 %v589_v55, %v588_v32  ;;  %v575_v9 = vsel %vm573_vm10, %v563_v6, 2102212464 }
  0xe0   : > { %v2876_v37 = vsel %vm2803_vm6, %v2624_v12, %v351_v58  ;;  %v592_v20 = vmul.u32 %v590_v59, %v587_v35  ;;  %v2892_v21 = vsel %vm385_vm12, %v507_v27, %v483_v41  ;;  %v591_v17 = vmul.u32 %v589_v55, %v587_v35 }
  0xe1   : > { %v356_v47 = vmul.f32 %v2876_v37, %v2876_v37  ;;  %vm2261_vm15 = vcmp.lt.s32.totalorder %v2260_v62, 0  ;;  %v613_v39 = vmul.u32 %v611_v56, %v587_v35  ;;  %v614_v34 = vmul.u32 %v612_v61, %v587_v35 }
  0xe2   : > { %v492_v19 = vsel %vm2261_vm15, 0, %v2260_v62  ;;  %v594_v23 = vmul.u32 %v590_v59, %v588_v32  ;;  %v595_v24 = vshll.u32 %v592_v20, 16  ;;  %v597_v38 = vshll.u32 %v2884_v3, 16 }
  0xe3   : > { %v357_v63 = vmul.f32 -0.001358992, %v356_v47  ;;  %v364_v29 = vmul.f32 -0.00019511016, %v356_v47  ;;  %v493_v18 = vsub.s32 32, %v492_v19  ;;  %v497_v15 = vsub.s32 4294967266, %v492_v19 }
  0xe4   : > { %v494_v6 = vshll.u32 %v2833_v30, %v492_v19  ;;  %vm599_vm0 = vc.u32 %v591_v17, %v595_v24  ;;  %v601_v41 = vadd.s32 %v595_v24, %v591_v17  ;;  %v615_v7 = vmul.u32 %v611_v56, %v588_v32 }
  0xe5   : > { %v358_v26 = vadd.f32 0.041655596, %v357_v63  ;;  %v365_v43 = vadd.f32 0.008332121, %v364_v29  ;;  %v495_v5 = vshrl.u32 %v477_v0, %v493_v18  ;;  %v498_v14 = vadd.s32 127, %v497_v15 }
  0xe6   : > { %vm2898_vm1 = vcmp.le.f32.partialorder %v383_v16, 0.7853982  ;;  %v600_v53 = vsel %vm599_vm0, 1, %v2479_v2  ;;  %v617_v46 = vshll.u32 %v614_v34, 16  ;;  %vm603_vm2 = vc.u32 %v601_v41, %v597_v38 }
  0xe7   : > { %v359_v49 = vmul.f32 %v358_v26, %v356_v47  ;;  %v366_v40 = vmul.f32 %v365_v43, %v356_v47  ;;  %v496_v27 = vor.u32 %v495_v5, %v494_v6  ;;  %v499_v52 = vshll.u32 %v498_v14, 23 }
  0xe8   : > { %v602_v35 = vadd.s32 %v600_v53, %v594_v23  ;;  %v596_v58 = vshrl.u32 %v592_v20, 16  ;;  %v604_v56 = vsel %vm603_vm2, 1, %v2479_v2  ;;  %vm375_vm3 = vcmp.eq.s32.totalorder %v2859_v4, 0 }
  0xe9   : > { %v360_v30 = vadd.f32 -0.4999988, %v359_v49  ;;  %v367_v55 = vadd.f32 -0.16666654, %v366_v40  ;;  %v500_v62 = vor.u32 4788187, %v499_v52  ;;  %v616_v16 = vmul.u32 %v612_v61, %v588_v32 }
  0xea   : > { %v606_v59 = vadd.s32 %v604_v56, %v602_v35  ;;  %v619_v0 = vshll.u32 %v615_v7, 16  ;;  %vm374_vm4 = vcmp.lt.s32.totalorder %v2859_v4, 2  ;;  %vm621_vm5 = vc.u32 %v613_v39, %v617_v46 }
  0xeb   : > { %v361_v19 = vmul.f32 %v360_v30, %v356_v47  ;;  %v368_v17 = vmul.f32 %v367_v55, %v356_v47  ;;  %v623_v63 = vadd.s32 %v617_v46, %v613_v39  ;;  %v501_v29 = vand.u32 2147483647, %v500_v62 }
  0xec   : > { %v503_v18 = vcvt.s32.f32 %v496_v27  ;;  %v607_v15 = vadd.s32 %v606_v59, %v596_v58  ;;  %v622_v23 = vsel %vm621_vm5, 1, %v2479_v2  ;;  %v576_v32 = vsel %vm572_vm11, %v2825_v31, %v575_v9 }
  0xed   : > { %v362_v20 = vadd.f32 1.0, %v361_v19  ;;  %v369_v24 = vadd.f32 1.0, %v368_v17  ;;  %v624_v38 = vadd.s32 %v622_v23, %v616_v16  ;;  %vm625_vm6 = vc.u32 %v623_v63, %v619_v0 }
  0xee   : > { %v504_v26 = vmul.f32 %v503_v18, %v501_v29  ;;  %v598_v61 = vshrl.u32 %v2884_v3, 16  ;;  %v626_v47 = vsel %vm625_vm6, 1, %v2479_v2  ;;  %v618_v6 = vshrl.u32 %v614_v34, 16 }
  0xef   : > { %v370_v39 = vmul.f32 %v369_v24, %v2876_v37  ;;  %v379_v43 = vxor.u32 2147483648, %v362_v20  ;;  %v628_v5 = vadd.s32 %v626_v47, %v624_v38  ;;  %vm378_vm7 = vcmp.eq.s32.totalorder %v2859_v4, 2 }
  0xf0   : > { %v505_v14 = vxor.u32 2147483648, %v504_v26  ;;  %v510_v41 = vsel %vm2898_vm1, 0, %v2892_v21  ;;  %v608_v49 = vadd.s32 %v607_v15, %v598_v61  ;;  %v620_v53 = vshrl.u32 %v615_v7, 16 }
  0xf1   : > { %v376_v40 = vxor.u32 2147483648, %v370_v39  ;;  %v629_v31 = vadd.s32 %v628_v5, %v618_v6  ;;  %v696_v3 = vand.u32 2139095040, %v2829_v10  ;;  %v380_v9 = vsel %vm378_vm7, %v379_v43, %v370_v39 }
  0xf2   : > { %v506_v37 = vsel %vm385_vm12, %v505_v14, %v504_v26  ;;  %v577_v34 = vsel %vm571_vm14, %v2882_v1, %v576_v32  ;;  %v627_v46 = vadd.s32 %v623_v63, %v619_v0  ;;  %vm371_vm8 = vweird.f32 %v2624_v12  ;;  %v2935_v12 = vld [vmem:[%s2591_s11 + $0x1] ss:$4 sm:$0x3] }
  0xf3   : > { %v377_v27 = vsel %vm375_vm3, %v362_v20, %v376_v40  ;;  %v509_v21 = vsel %vm2898_vm1, %v2627_v13, %v506_v37  ;;  %v630_v7 = vadd.s32 %v629_v31, %v620_v53  ;;  %v697_v52 = vshrl.u32 %v696_v3, 23 }
  0xf4   : > { %v381_v35 = vsel %vm374_vm4, %v377_v27, %v380_v9  ;;  %v511_v30 = vmul.f32 %v509_v21, %v509_v21  ;;  %vm633_vm9 = vc.u32 %v608_v49, %v627_v46  ;;  %v527_v1 = vadd.s32 3, %v510_v41 }
  0xf5   : > { %v382_v45 = vsel %vm371_vm8, nan, %v381_v35  ;;  %v634_v55 = vadd.s32 1, %v630_v7  ;;  %v2265_v58 = vadd.s32 4294967169, %v697_v52  ;;  %v631_v59 = vmul.u32 %v2844_v25, %v577_v34 }
  0xf6   : > { %v512_v56 = vmul.f32 -0.001358992, %v511_v30  ;;  %v519_v62 = vmul.f32 -0.00019511016, %v511_v30  ;;  %848 = vst [vmem:[#allocation2 + $0x30] sm:$0xff] %v382_v45  ;;  %v528_v63 = vand.u32 3, %v527_v1  ;;  %vm526_vm13 = vweird.f32 %v2627_v13 }
  0xf7   : > { %v635_v50 = vsel %vm633_vm9, %v634_v55, %v630_v7  ;;  %v700_v16 = vand.u32 8388607, %v693_v28  ;;  %v703_v0 = vadd.s32 1, %v2265_v58  ;;  %v855_v25 = vperm.slane %v2935_v12, 0 }
  0xf8   : > { %v513_v4 = vadd.f32 0.041655596, %v512_v56  ;;  %v520_v19 = vadd.f32 0.008332121, %v519_v62  ;;  %v636_v17 = vadd.s32 %v635_v50, %v631_v59  ;;  %v856_v61 = vperm.slane %v2935_v12, 1 }
  0xf9   : > { %vm704_vm10 = vcmp.gt.s32.totalorder %v703_v0, 0  ;;  %v701_v20 = vor.u32 8388608, %v700_v16  ;;  %vm529_vm11 = vcmp.lt.s32.totalorder %v528_v63, 2  ;;  %vm530_vm12 = vcmp.eq.s32.totalorder %v528_v63, 0 }
  0xfa   : > { %v514_v29 = vmul.f32 %v513_v4, %v511_v30  ;;  %v521_v18 = vmul.f32 %v520_v19, %v511_v30  ;;  %v637_v15 = vadd.s32 536870912, %v636_v17  ;;  %v705_v23 = vsel %vm704_vm10, %v703_v0, 0 }
  0xfb   : > { %v707_v24 = vand.u32 31, %v705_v23  ;;  %vm533_vm14 = vcmp.eq.s32.totalorder %v528_v63, 2  ;;  %v632_v5 = vadd.s32 %v627_v46, %v608_v49  ;;  %v2945_v14 = vshll.u32 %v701_v20, 8 }
  0xfc   : > { %v515_v38 = vadd.f32 -0.4999988, %v514_v29  ;;  %v522_v26 = vadd.f32 -0.16666654, %v521_v18  ;;  %v2938_v32 = vshrl.u32 %v637_v15, 30  ;;  %v859_v41 = vmul.f32 %v855_v25, %v2615_v8 }
  0xfd   : > { %v2941_v47 = vsub.s32 32, %v707_v24  ;;  %v2953_v3 = vmul.f32 %v856_v61, %v2615_v8  ;;  %v2955_v9 = vshrl.u32 %v705_v23, 5  ;;  %vm540_vm0 = vcmp.lt.s32.totalorder %v2647_v36, 0 }
  0xfe   : > { %v516_v39 = vmul.f32 %v515_v38, %v511_v30  ;;  %v523_v43 = vmul.f32 %v522_v26, %v511_v30  ;;  %v639_v6 = vshll.u32 %v2938_v32, 30  ;;  %v710_v52 = vshll.u32 %v2480_v42, %v707_v24 }
  0xff   : > { %v711_v37 = vshrl.u32 %v2481_v44, %v2941_v47  ;;  %v714_v49 = vshrl.u32 %v2482_v48, %v2941_v47  ;;  %v717_v34 = vshrl.u32 %v2483_v51, %v2941_v47  ;;  %v713_v35 = vshll.u32 %v2481_v44, %v707_v24 }
 0x100   : > { %v517_v40 = vadd.f32 1.0, %v516_v39  ;;  %v524_v53 = vadd.f32 1.0, %v523_v43  ;;  %v640_v31 = vsub.s32 %v636_v17, %v639_v6  ;;  %v719_v30 = vshll.u32 %v2483_v51, %v707_v24 }
 0x101   : > { %v720_v45 = vshrl.u32 %v2484_v54, %v2941_v47  ;;  %v716_v58 = vshll.u32 %v2482_v48, %v707_v24  ;;  %v712_v62 = vor.u32 %v711_v37, %v710_v52  ;;  %v715_v59 = vor.u32 %v714_v49, %v713_v35 }
 0x102   : > { %v525_v46 = vmul.f32 %v524_v53, %v509_v21  ;;  %v534_v27 = vxor.u32 2147483648, %v517_v40  ;;  %vm641_vm15 = vcmp.lt.s32.totalorder %v640_v31, 0  ;;  %v642_v7 = vsub.s32 0, %v640_v31 }
 0x103   : > { %v723_v21 = vshrl.u32 %v2485_v57, %v2941_v47  ;;  %v721_v50 = vor.u32 %v720_v45, %v719_v30  ;;  %v718_v4 = vor.u32 %v717_v34, %v716_v58  ;;  %v722_v19 = vshll.u32 %v2484_v54, %v707_v24 }
 0x104   : > { %v531_v1 = vxor.u32 2147483648, %v525_v46  ;;  %v643_v55 = vsel %vm641_vm15, %v642_v7, %v640_v31  ;;  %v535_v0 = vsel %vm533_vm14, %v534_v27, %v525_v46  ;;  %vm2978_vm1 = vcmp.le.f32.partialorder %v538_v60, 0.7853982 }
 0x105   : > { %v644_v56 = vclz %v643_v55  ;;  %v662_v15 = vsub.s32 4, %v2938_v32  ;;  %v742_v23 = vand.u32 65535, %v2945_v14  ;;  %v724_v38 = vor.u32 %v723_v21, %v722_v19 }
 0x106   : > { %v532_v16 = vsel %vm530_vm12, %v517_v40, %v531_v1  ;;  %vm725_vm2 = vcmp.lt.s32.totalorder %v2955_v9, 1  ;;  %vm728_vm3 = vcmp.lt.s32.totalorder %v2955_v9, 4  ;;  %vm727_vm5 = vcmp.lt.s32.totalorder %v2955_v9, 3 }
 0x107   : > { %v536_v17 = vsel %vm529_vm11, %v532_v16, %v535_v0  ;;  %v2263_v18 = vadd.s32 4294967294, %v644_v56  ;;  %v733_v60 = vsel %vm725_vm2, %v712_v62, %v715_v59  ;;  %v734_v63 = vsel %vm728_vm3, %v721_v50, 920167782 }
 0x108   : > { %v537_v20 = vsel %vm526_vm13, nan, %v536_v17  ;;  %v735_v13 = vsel %vm727_vm5, %v718_v4, %v734_v63  ;;  %v743_v26 = vshrl.u32 %v2945_v14, 16  ;;  %v2997_v39 = vadd.f32 %v859_v41, %v2621_v11 }
 0x109   : > { %vm2264_vm4 = vcmp.lt.s32.totalorder %v2263_v18, 0  ;;  %849 = vst [vmem:[#allocation2] sm:$0xff] %v537_v20  ;;  %vm726_vm6 = vcmp.lt.s32.totalorder %v2955_v9, 2  ;;  %v737_v40 = vsel %vm725_vm2, %v715_v59, %v718_v4  ;;  %v663_v37 = vsel %vm540_vm0, %v662_v15, %v2938_v32 }
 0x10a   : > { %v647_v24 = vsel %vm2264_vm4, 0, %v2263_v18  ;;  %v736_v49 = vsel %vm726_vm6, %v733_v60, %v735_v13  ;;  %v738_v34 = vsel %vm728_vm3, %v724_v38, 1326507024  ;;  %v709_v52 = vshrl.u32 %v2480_v42, %v2941_v47 }
 0x10b   : > { %v648_v43 = vsub.s32 32, %v647_v24  ;;  %v652_v6 = vsub.s32 4294967266, %v647_v24  ;;  %v649_v53 = vshll.u32 %v640_v31, %v647_v24  ;;  %v739_v27 = vsel %vm727_vm5, %v721_v50, %v738_v34 }
 0x10c   : > { %v766_v7 = vand.u32 65535, %v736_v49  ;;  %v730_v31 = vsel %vm728_vm3, %v718_v4, 2102212464  ;;  %v740_v32 = vsel %vm726_vm6, %v737_v40, %v739_v27  ;;  %v767_v35 = vshrl.u32 %v736_v49, 16 }
 0x10d   : > { %v650_v41 = vshrl.u32 %v632_v5, %v648_v43  ;;  %v653_v46 = vadd.s32 127, %v652_v6  ;;  %v744_v1 = vand.u32 65535, %v740_v32  ;;  %v745_v55 = vshrl.u32 %v740_v32, 16 }
 0x10e   : > { %v665_v5 = vsel %vm2978_vm1, 0, %v663_v37  ;;  %v729_v58 = vsel %vm725_vm2, %v709_v52, %v712_v62  ;;  %v769_v21 = vmul.u32 %v767_v35, %v742_v23  ;;  %v770_v56 = vmul.u32 %v766_v7, %v743_v26 }
 0x10f   : > { %v651_v30 = vor.u32 %v650_v41, %v649_v53  ;;  %v654_v45 = vshll.u32 %v653_v46, 23  ;;  %v731_v50 = vsel %vm727_vm5, %v715_v59, %v730_v31  ;;  %v747_v16 = vmul.u32 %v745_v55, %v742_v23 }
 0x110   : > { %v870_v0 = vand.u32 2139095040, %v2997_v39  ;;  %v748_v4 = vmul.u32 %v744_v1, %v743_v26  ;;  %v768_v19 = vmul.u32 %v766_v7, %v742_v23  ;;  %v771_v17 = vmul.u32 %v767_v35, %v743_v26 }
 0x111   : > { %v655_v47 = vor.u32 4788187, %v654_v45  ;;  %v772_v18 = vshll.u32 %v769_v21, 16  ;;  %v658_v20 = vcvt.s32.f32 %v651_v30  ;;  %v746_v38 = vmul.u32 %v744_v1, %v742_v23 }
 0x112   : > { %v750_v60 = vshll.u32 %v747_v16, 16  ;;  %v749_v63 = vmul.u32 %v745_v55, %v743_v26  ;;  %v752_v24 = vshll.u32 %v748_v4, 16  ;;  %v774_v62 = vshll.u32 %v770_v56, 16 }
 0x113   : > { %v656_v15 = vand.u32 2147483647, %v655_v47  ;;  %vm776_vm7 = vc.u32 %v768_v19, %v772_v18  ;;  %v778_v40 = vadd.s32 %v772_v18, %v768_v19  ;;  %v871_v37 = vshrl.u32 %v870_v0, 23 }
 0x114   : > { %vm754_vm8 = vc.u32 %v746_v38, %v750_v60  ;;  %v756_v43 = vadd.s32 %v750_v60, %v746_v38  ;;  %v777_v59 = vsel %vm776_vm7, 1, %v2479_v2  ;;  %v682_v34 = vadd.s32 3, %v665_v5 }
 0x115   : > { %v659_v13 = vmul.f32 %v658_v20, %v656_v15  ;;  %v755_v6 = vsel %vm754_vm8, 1, %v2479_v2  ;;  %v779_v53 = vadd.s32 %v777_v59, %v771_v17  ;;  %v732_v23 = vsel %vm726_vm6, %v729_v58, %v731_v50 }
 0x116   : > { %v757_v41 = vadd.s32 %v755_v6, %v749_v63  ;;  %vm758_vm9 = vc.u32 %v756_v43, %v752_v24  ;;  %vm780_vm10 = vc.u32 %v778_v40, %v774_v62  ;;  %v2269_v46 = vadd.s32 4294967169, %v871_v37 }
 0x117   : > { %v660_v49 = vxor.u32 2147483648, %v659_v13  ;;  %v759_v26 = vsel %vm758_vm9, 1, %v2479_v2  ;;  %v751_v7 = vshrl.u32 %v747_v16, 16  ;;  %v781_v31 = vsel %vm780_vm10, 1, %v2479_v2 }
 0x118   : > { %v761_v52 = vadd.s32 %v759_v26, %v757_v41  ;;  %v773_v35 = vshrl.u32 %v769_v21, 16  ;;  %v783_v30 = vadd.s32 %v781_v31, %v779_v53  ;;  %v877_v45 = vadd.s32 1, %v2269_v46 }
 0x119   : > { %v661_v27 = vsel %vm540_vm0, %v660_v49, %v659_v13  ;;  %v753_v1 = vshrl.u32 %v748_v4, 16  ;;  %v867_v5 = vand.u32 2147483647, %v2997_v39  ;;  %v775_v58 = vshrl.u32 %v770_v56, 16 }
 0x11a   : > { %v664_v32 = vsel %vm2978_vm1, %v2647_v36, %v661_v27  ;;  %v762_v55 = vadd.s32 %v761_v52, %v751_v7  ;;  %v3036_v47 = vadd.s32 %v778_v40, %v774_v62  ;;  %v784_v50 = vadd.s32 %v783_v30, %v773_v35 }
 0x11b   : > { %v666_v9 = vmul.f32 %v664_v32, %v664_v32  ;;  %vm878_vm11 = vcmp.gt.s32.totalorder %v877_v45, 0  ;;  %v3044_v4 = vadd.f32 %v2953_v3, %v2621_v11  ;;  %v683_v56 = vand.u32 3, %v682_v34 }
 0x11c   : > { %v3038_v19 = vadd.s32 %v762_v55, %v753_v1  ;;  %v879_v17 = vsel %vm878_vm11, %v877_v45, 0  ;;  %v785_v29 = vadd.s32 %v784_v50, %v775_v58  ;;  %v786_v20 = vmul.u32 %v2945_v14, %v732_v23 }
 0x11d   : > { %v667_v16 = vmul.f32 -0.001358992, %v666_v9  ;;  %v674_v0 = vmul.f32 -0.00019511016, %v666_v9  ;;  %v881_v18 = vand.u32 31, %v879_v17  ;;  %v3051_v13 = vshrl.u32 %v879_v17, 5 }
 0x11e   : > { %vm788_vm12 = vc.u32 %v3038_v19, %v3036_v47  ;;  %v789_v38 = vadd.s32 1, %v785_v29  ;;  %v874_v62 = vand.u32 8388607, %v867_v5  ;;  %vm684_vm13 = vcmp.lt.s32.totalorder %v683_v56, 2 }
 0x11f   : > { %v668_v21 = vadd.f32 0.041655596, %v667_v16  ;;  %v675_v15 = vadd.f32 0.008332121, %v674_v0  ;;  %v3047_v60 = vsub.s32 32, %v881_v18  ;;  %v884_v59 = vshll.u32 %v2480_v42, %v881_v18 }
 0x120   : > { %v790_v43 = vsel %vm788_vm12, %v789_v38, %v785_v29  ;;  %v887_v49 = vshll.u32 %v2481_v44, %v881_v18  ;;  %v890_v34 = vshll.u32 %v2482_v48, %v881_v18  ;;  %v893_v41 = vshll.u32 %v2483_v51, %v881_v18 }
 0x121   : > { %v669_v63 = vmul.f32 %v668_v21, %v666_v9  ;;  %v676_v24 = vmul.f32 %v675_v15, %v666_v9  ;;  %v885_v3 = vshrl.u32 %v2481_v44, %v3047_v60  ;;  %v888_v6 = vshrl.u32 %v2482_v48, %v3047_v60 }
 0x122   : > { %v791_v53 = vadd.s32 %v790_v43, %v786_v20  ;;  %v891_v37 = vshrl.u32 %v2483_v51, %v3047_v60  ;;  %v894_v23 = vshrl.u32 %v2484_v54, %v3047_v60  ;;  %v896_v35 = vshll.u32 %v2484_v54, %v881_v18 }
 0x123   : > { %v670_v14 = vadd.f32 -0.4999988, %v669_v63  ;;  %v677_v40 = vadd.f32 -0.16666654, %v676_v24  ;;  %v3065_v7 = vor.u32 %v885_v3, %v884_v59  ;;  %v3067_v52 = vor.u32 %v888_v6, %v887_v49 }
 0x124   : > { %v792_v27 = vadd.s32 536870912, %v791_v53  ;;  %v895_v31 = vor.u32 %v894_v23, %v893_v41  ;;  %v897_v30 = vshrl.u32 %v2485_v57, %v3047_v60  ;;  %v892_v58 = vor.u32 %v891_v37, %v890_v34 }
 0x125   : > { %v671_v26 = vmul.f32 %v670_v14, %v666_v9  ;;  %v678_v46 = vmul.f32 %v677_v40, %v666_v9  ;;  %vm685_vm14 = vcmp.eq.s32.totalorder %v683_v56, 0  ;;  %vm688_vm15 = vcmp.eq.s32.totalorder %v683_v56, 2 }
 0x126   : > { %v3072_v55 = vshrl.u32 %v792_v27, 30  ;;  %v875_v9 = vor.u32 8388608, %v874_v62  ;;  %v898_v50 = vor.u32 %v897_v30, %v896_v35  ;;  %vm902_vm0 = vcmp.lt.s32.totalorder %v3051_v13, 4 }
 0x127   : > { %v672_v45 = vadd.f32 1.0, %v671_v26  ;;  %v679_v1 = vadd.f32 1.0, %v678_v46  ;;  %vm899_vm1 = vcmp.lt.s32.totalorder %v3051_v13, 1  ;;  %vm901_vm2 = vcmp.lt.s32.totalorder %v3051_v13, 3 }
 0x128   : > { %v794_v17 = vshll.u32 %v3072_v55, 30  ;;  %v908_v29 = vsel %vm902_vm0, %v895_v31, 920167782  ;;  %v912_v18 = vsel %vm902_vm0, %v898_v50, 1326507024  ;;  %v911_v20 = vsel %vm899_vm1, %v3067_v52, %v892_v58 }
 0x129   : > { %v680_v16 = vmul.f32 %v679_v1, %v664_v32  ;;  %v689_v0 = vxor.u32 2147483648, %v672_v45  ;;  %v907_v32 = vsel %vm899_vm1, %v3065_v7, %v3067_v52  ;;  %vm900_vm3 = vcmp.lt.s32.totalorder %v3051_v13, 2 }
 0x12a   : > { %v795_v15 = vsub.s32 %v791_v53, %v794_v17  ;;  %v909_v38 = vsel %vm901_vm2, %v892_v58, %v908_v29  ;;  %v913_v63 = vsel %vm901_vm2, %v895_v31, %v912_v18  ;;  %v3094_v24 = vshll.u32 %v875_v9, 8 }
 0x12b   : > { %v686_v21 = vxor.u32 2147483648, %v680_v16  ;;  %v690_v43 = vsel %vm688_vm15, %v689_v0, %v680_v16  ;;  %vm681_vm5 = vweird.f32 %v2647_v36  ;;  %v910_v6 = vsel %vm900_vm3, %v907_v32, %v909_v38 }
 0x12c   : > { %vm796_vm4 = vcmp.lt.s32.totalorder %v795_v15, 0  ;;  %v797_v59 = vsub.s32 0, %v795_v15  ;;  %v914_v14 = vsel %vm900_vm3, %v911_v20, %v913_v63  ;;  %v3107_v37 = vmul.f32 %v855_v25, %v2637_v22 }
 0x12d   : > { %v687_v62 = vsel %vm685_vm14, %v672_v45, %v686_v21  ;;  %v916_v34 = vand.u32 65535, %v3094_v24  ;;  %v918_v36 = vand.u32 65535, %v914_v14  ;;  %v919_v56 = vshrl.u32 %v914_v14, 16 }
 0x12e   : > { %v691_v3 = vsel %vm684_vm13, %v687_v62, %v690_v43  ;;  %v798_v53 = vsel %vm796_vm4, %v797_v59, %v795_v15  ;;  %v917_v41 = vshrl.u32 %v3094_v24, 16  ;;  %v940_v23 = vand.u32 65535, %v910_v6 }
 0x12f   : > { %v692_v40 = vsel %vm681_vm5, nan, %v691_v3  ;;  %v799_v49 = vclz %v798_v53  ;;  %v941_v26 = vshrl.u32 %v910_v6, 16  ;;  %v1022_v46 = vand.u32 2147483647, %v3044_v4 }
 0x130   : > { %850 = vst [vmem:[#allocation2 + $0x58] sm:$0xff] %v692_v40  ;;  %v787_v27 = vadd.s32 %v3036_v47, %v3038_v19  ;;  %v921_v35 = vmul.u32 %v919_v56, %v916_v34  ;;  %v1025_v25 = vand.u32 2139095040, %v3044_v4  ;;  %vm695_vm6 = vcmp.lt.s32.totalorder %v2829_v10, 0 }
 0x131   : > { %v2266_v31 = vadd.s32 4294967294, %v799_v49  ;;  %v817_v30 = vsub.s32 4, %v3072_v55  ;;  %v883_v45 = vshrl.u32 %v2480_v42, %v3047_v60  ;;  %v922_v1 = vmul.u32 %v918_v36, %v917_v41 }
 0x132   : > { %v943_v9 = vmul.u32 %v941_v26, %v916_v34  ;;  %v904_v50 = vsel %vm902_vm0, %v892_v58, 2102212464  ;;  %v920_v16 = vmul.u32 %v918_v36, %v916_v34  ;;  %v924_v0 = vshll.u32 %v921_v35, 16 }
 0x133   : > { %vm2267_vm7 = vcmp.lt.s32.totalorder %v2266_v31, 0  ;;  %v923_v19 = vmul.u32 %v919_v56, %v917_v41  ;;  %v944_v17 = vmul.u32 %v940_v23, %v917_v41  ;;  %v942_v32 = vmul.u32 %v940_v23, %v916_v34 }
 0x134   : > { %v802_v47 = vsel %vm2267_vm7, 0, %v2266_v31  ;;  %v946_v29 = vshll.u32 %v943_v9, 16  ;;  %vm928_vm8 = vc.u32 %v920_v16, %v924_v0  ;;  %vm3123_vm9 = vcmp.le.f32.partialorder %v693_v28, 0.7853982 }
 0x135   : > { %v803_v18 = vsub.s32 32, %v802_v47  ;;  %v807_v21 = vsub.s32 4294967266, %v802_v47  ;;  %v926_v20 = vshll.u32 %v922_v1, 16  ;;  %v929_v38 = vsel %vm928_vm8, 1, %v2479_v2 }
 0x136   : > { %v930_v58 = vadd.s32 %v924_v0, %v920_v16  ;;  %v945_v63 = vmul.u32 %v941_v26, %v917_v41  ;;  %v804_v62 = vshll.u32 %v795_v15, %v802_v47  ;;  %v931_v3 = vadd.s32 %v929_v38, %v923_v19 }
 0x137   : > { %v805_v43 = vshrl.u32 %v787_v27, %v803_v18  ;;  %v808_v59 = vadd.s32 127, %v807_v21  ;;  %v948_v6 = vshll.u32 %v944_v17, 16  ;;  %vm950_vm11 = vc.u32 %v942_v32, %v946_v29 }
 0x138   : > { %vm932_vm10 = vc.u32 %v930_v58, %v926_v20  ;;  %v952_v14 = vadd.s32 %v946_v29, %v942_v32  ;;  %v951_v49 = vsel %vm950_vm11, 1, %v2479_v2  ;;  %v925_v34 = vshrl.u32 %v921_v35, 16 }
 0x139   : > { %v806_v40 = vor.u32 %v805_v43, %v804_v62  ;;  %v809_v53 = vshll.u32 %v808_v59, 23  ;;  %v933_v28 = vsel %vm932_vm10, 1, %v2479_v2  ;;  %v953_v56 = vadd.s32 %v951_v49, %v945_v63 }
 0x13a   : > { %v935_v36 = vadd.s32 %v933_v28, %v931_v3  ;;  %vm954_vm12 = vc.u32 %v952_v14, %v948_v6  ;;  %v818_v15 = vsel %vm695_vm6, %v817_v30, %v3072_v55  ;;  %v927_v41 = vshrl.u32 %v922_v1, 16 }
 0x13b   : > { %v810_v23 = vor.u32 4788187, %v809_v53  ;;  %v955_v26 = vsel %vm954_vm12, 1, %v2479_v2  ;;  %v947_v31 = vshrl.u32 %v943_v9, 16  ;;  %v1026_v0 = vshrl.u32 %v1025_v25, 23 }
 0x13c   : > { %v936_v27 = vadd.s32 %v935_v36, %v925_v34  ;;  %v957_v16 = vadd.s32 %v955_v26, %v953_v56  ;;  %v813_v19 = vcvt.s32.f32 %v806_v40  ;;  %v903_v35 = vsel %vm899_vm1, %v883_v45, %v3065_v7 }
 0x13d   : > { %v811_v47 = vand.u32 2147483647, %v810_v23  ;;  %v905_v29 = vsel %vm901_vm2, %v3067_v52, %v904_v50  ;;  %v949_v21 = vshrl.u32 %v944_v17, 16  ;;  %v2272_v30 = vadd.s32 4294967169, %v1026_v0 }
 0x13e   : > { %v937_v18 = vadd.s32 %v936_v27, %v927_v41  ;;  %v958_v55 = vadd.s32 %v957_v16, %v947_v31  ;;  %v820_v9 = vsel %vm3123_vm9, 0, %v818_v15  ;;  %v3144_v25 = vadd.f32 %v3107_v37, %v2644_v33 }
 0x13f   : > { %v814_v1 = vmul.f32 %v813_v19, %v811_v47  ;;  %v956_v32 = vadd.s32 %v952_v14, %v948_v6  ;;  %v906_v7 = vsel %vm900_vm3, %v903_v35, %v905_v29  ;;  %v1029_v52 = vand.u32 8388607, %v1022_v46 }
 0x140   : > { %v959_v45 = vadd.s32 %v958_v55, %v949_v21  ;;  %v1032_v50 = vadd.s32 1, %v2272_v30  ;;  %v837_v20 = vadd.s32 3, %v820_v9  ;;  %v960_v37 = vmul.u32 %v3094_v24, %v906_v7 }
 0x141   : > { %v815_v17 = vxor.u32 2147483648, %v814_v1  ;;  %vm962_vm13 = vc.u32 %v937_v18, %v956_v32  ;;  %v1177_v62 = vand.u32 2147483647, %v3144_v25  ;;  %v1030_v59 = vor.u32 8388608, %v1029_v52 }
 0x142   : > { %v963_v38 = vadd.s32 1, %v959_v45  ;;  %vm1033_vm14 = vcmp.gt.s32.totalorder %v1032_v50, 0  ;;  %v3159_v49 = vand.u32 3, %v837_v20  ;;  %v3161_v24 = vadd.s32 %v956_v32, %v937_v18 }
 0x143   : > { %v816_v58 = vsel %vm695_vm6, %v815_v17, %v814_v1  ;;  %v1034_v63 = vsel %vm1033_vm14, %v1032_v50, 0  ;;  %v3163_v36 = vshll.u32 %v1030_v59, 8  ;;  %v1180_v56 = vand.u32 2139095040, %v3144_v25 }
 0x144   : > { %v819_v13 = vsel %vm3123_vm9, %v2829_v10, %v816_v58  ;;  %v964_v43 = vsel %vm962_vm13, %v963_v38, %v959_v45  ;;  %v1036_v3 = vand.u32 31, %v1034_v63  ;;  %v3168_v60 = vand.u32 8388607, %v1177_v62 }
 0x145   : > { %v821_v6 = vmul.f32 %v819_v13, %v819_v13  ;;  %v965_v14 = vadd.s32 %v964_v43, %v960_v37  ;;  %v3174_v27 = vshrl.u32 %v1034_v63, 5  ;;  %vm843_vm15 = vcmp.eq.s32.totalorder %v3159_v49, 2 }
 0x146   : > { %v3157_v40 = vsub.s32 32, %v1036_v3  ;;  %v1039_v29 = vshll.u32 %v2480_v42, %v1036_v3  ;;  %v1042_v18 = vshll.u32 %v2481_v44, %v1036_v3  ;;  %v1045_v21 = vshll.u32 %v2482_v48, %v1036_v3 }
 0x147   : > { %v822_v53 = vmul.f32 -0.001358992, %v821_v6  ;;  %v829_v28 = vmul.f32 -0.00019511016, %v821_v6  ;;  %v966_v34 = vadd.s32 536870912, %v965_v14  ;;  %v1048_v55 = vshll.u32 %v2483_v51, %v1036_v3 }
 0x148   : > { %v1040_v26 = vshrl.u32 %v2481_v44, %v3157_v40  ;;  %v1043_v31 = vshrl.u32 %v2482_v48, %v3157_v40  ;;  %v1046_v16 = vshrl.u32 %v2483_v51, %v3157_v40  ;;  %v1049_v0 = vshrl.u32 %v2484_v54, %v3157_v40 }
 0x149   : > { %v823_v23 = vadd.f32 0.041655596, %v822_v53  ;;  %v830_v15 = vadd.f32 0.008332121, %v829_v28  ;;  %v3170_v41 = vshrl.u32 %v966_v34, 30  ;;  %v1052_v30 = vshrl.u32 %v2485_v57, %v3157_v40 }
 0x14a   : > { %v1041_v7 = vor.u32 %v1040_v26, %v1039_v29  ;;  %vm840_vm0 = vcmp.eq.s32.totalorder %v3159_v49, 0  ;;  %v3193_v45 = vor.u32 %v1043_v31, %v1042_v18  ;;  %v1047_v52 = vor.u32 %v1046_v16, %v1045_v21 }
 0x14b   : > { %v824_v47 = vmul.f32 %v823_v23, %v821_v6  ;;  %v831_v19 = vmul.f32 %v830_v15, %v821_v6  ;;  %v968_v35 = vshll.u32 %v3170_v41, 30  ;;  %v1050_v50 = vor.u32 %v1049_v0, %v1048_v55 }
 0x14c   : > { %v1051_v17 = vshll.u32 %v2484_v54, %v1036_v3  ;;  %vm839_vm1 = vcmp.lt.s32.totalorder %v3159_v49, 2  ;;  %vm836_vm3 = vweird.f32 %v2829_v10  ;;  %vm869_vm4 = vcmp.lt.s32.totalorder %v2997_v39, 0 }
 0x14d   : > { %v825_v1 = vadd.f32 -0.4999988, %v824_v47  ;;  %v832_v9 = vadd.f32 -0.16666654, %v831_v19  ;;  %v3190_v32 = vsub.s32 %v965_v14, %v968_v35  ;;  %vm1054_vm5 = vcmp.lt.s32.totalorder %v3174_v27, 1 }
 0x14e   : > { %v1053_v37 = vor.u32 %v1052_v30, %v1051_v17  ;;  %v1071_v63 = vand.u32 65535, %v3163_v36  ;;  %v1181_v43 = vshrl.u32 %v1180_v56, 23  ;;  %vm1057_vm6 = vcmp.lt.s32.totalorder %v3174_v27, 4 }
 0x14f   : > { %v826_v20 = vmul.f32 %v825_v1, %v821_v6  ;;  %v833_v38 = vmul.f32 %v832_v9, %v821_v6  ;;  %vm970_vm2 = vcmp.lt.s32.totalorder %v3190_v32, 0  ;;  %v971_v58 = vsub.s32 0, %v3190_v32 }
 0x150   : > { %vm1056_vm7 = vcmp.lt.s32.totalorder %v3174_v27, 3  ;;  %v1062_v53 = vsel %vm1054_vm5, %v1041_v7, %v3193_v45  ;;  %v1063_v28 = vsel %vm1057_vm6, %v1050_v50, 920167782  ;;  %v1072_v15 = vshrl.u32 %v3163_v36, 16 }
 0x151   : > { %v827_v59 = vadd.f32 1.0, %v826_v20  ;;  %v834_v3 = vadd.f32 1.0, %v833_v38  ;;  %v972_v6 = vsel %vm970_vm2, %v971_v58, %v3190_v32  ;;  %v1064_v56 = vsel %vm1056_vm7, %v1047_v52, %v1063_v28 }
 0x152   : > { %v973_v14 = vclz %v972_v6  ;;  %vm1055_vm8 = vcmp.lt.s32.totalorder %v3174_v27, 2  ;;  %v1066_v31 = vsel %vm1054_vm5, %v3193_v45, %v1047_v52  ;;  %v2275_v16 = vadd.s32 4294967169, %v1181_v43 }
 0x153   : > { %v835_v34 = vmul.f32 %v834_v3, %v819_v13  ;;  %v844_v23 = vxor.u32 2147483648, %v827_v59  ;;  %v991_v47 = vsub.s32 4, %v3170_v41  ;;  %v1065_v13 = vsel %vm1055_vm8, %v1062_v53, %v1064_v56 }
 0x154   : > { %v2270_v26 = vadd.s32 4294967294, %v973_v14  ;;  %v1067_v19 = vsel %vm1057_vm6, %v1053_v37, 1326507024  ;;  %v1096_v18 = vshrl.u32 %v1065_v13, 16  ;;  %v1095_v1 = vand.u32 65535, %v1065_v13 }
 0x155   : > { %v841_v0 = vxor.u32 2147483648, %v835_v34  ;;  %v845_v35 = vsel %vm843_vm15, %v844_v23, %v835_v34  ;;  %v1068_v29 = vsel %vm1056_vm7, %v1050_v50, %v1067_v19  ;;  %v1038_v38 = vshrl.u32 %v2480_v42, %v3157_v40 }
 0x156   : > { %vm2271_vm9 = vcmp.lt.s32.totalorder %v2270_v26, 0  ;;  %v1069_v30 = vsel %vm1055_vm8, %v1066_v31, %v1068_v29  ;;  %v3240_v58 = vsel %vm869_vm4, %v991_v47, %v3170_v41  ;;  %v1098_v6 = vmul.u32 %v1096_v18, %v1071_v63 }
 0x157   : > { %v842_v21 = vsel %vm840_vm0, %v827_v59, %v841_v0  ;;  %v976_v55 = vsel %vm2271_vm9, 0, %v2270_v26  ;;  %v1073_v37 = vand.u32 65535, %v1069_v30  ;;  %v1074_v43 = vshrl.u32 %v1069_v30, 16 }
 0x158   : > { %v846_v9 = vsel %vm839_vm1, %v842_v21, %v845_v35  ;;  %v977_v17 = vsub.s32 32, %v976_v55  ;;  %v981_v20 = vsub.s32 4294967266, %v976_v55  ;;  %v978_v59 = vshll.u32 %v3190_v32, %v976_v55 }
 0x159   : > { %v847_v50 = vsel %vm836_vm3, nan, %v846_v9  ;;  %v1058_v40 = vsel %vm1054_vm5, %v1038_v38, %v1041_v7  ;;  %v1076_v14 = vmul.u32 %v1074_v43, %v1071_v63  ;;  %v1077_v10 = vmul.u32 %v1073_v37, %v1072_v15 }
 0x15a   : > { %851 = vst [vmem:[#allocation2 + $0x18] sm:$0xff] %v847_v50  ;;  %v979_v49 = vshrl.u32 %v3161_v24, %v977_v17  ;;  %v982_v3 = vadd.s32 127, %v981_v20  ;;  %v1099_v53 = vmul.u32 %v1095_v1, %v1072_v15  ;;  %vm3248_vm10 = vcmp.le.f32.partialorder %v867_v5, 0.7853982 }
 0x15b   : > { %v1059_v32 = vsel %vm1057_vm6, %v1047_v52, 2102212464  ;;  %v1101_v24 = vshll.u32 %v1098_v6, 16  ;;  %v1075_v23 = vmul.u32 %v1073_v37, %v1071_v63  ;;  %v1078_v56 = vmul.u32 %v1074_v43, %v1072_v15 }
 0x15c   : > { %v980_v28 = vor.u32 %v979_v49, %v978_v59  ;;  %v983_v34 = vshll.u32 %v982_v3, 23  ;;  %v1079_v26 = vshll.u32 %v1076_v14, 16  ;;  %v1097_v31 = vmul.u32 %v1095_v1, %v1071_v63 }
 0x15d   : > { %v1081_v47 = vshll.u32 %v1077_v10, 16  ;;  %v1100_v13 = vmul.u32 %v1096_v18, %v1072_v15  ;;  %v1103_v5 = vshll.u32 %v1099_v53, 16  ;;  %v1187_v9 = vadd.s32 1, %v2275_v16 }
 0x15e   : > { %v984_v7 = vor.u32 4788187, %v983_v34  ;;  %v987_v0 = vcvt.s32.f32 %v980_v28  ;;  %vm1083_vm11 = vc.u32 %v1075_v23, %v1079_v26  ;;  %v1085_v19 = vadd.s32 %v1079_v26, %v1075_v23 }
 0x15f   : > { %vm1105_vm12 = vc.u32 %v1097_v31, %v1101_v24  ;;  %v1084_v29 = vsel %vm1083_vm11, 1, %v2479_v2  ;;  %v1107_v55 = vadd.s32 %v1101_v24, %v1097_v31  ;;  %v1060_v63 = vsel %vm1056_vm7, %v3193_v45, %v1059_v32 }
 0x160   : > { %v985_v35 = vand.u32 2147483647, %v984_v7  ;;  %v1106_v21 = vsel %vm1105_vm12, 1, %v2479_v2  ;;  %v1086_v52 = vadd.s32 %v1084_v29, %v1078_v56  ;;  %vm1087_vm13 = vc.u32 %v1085_v19, %v1081_v47 }
 0x161   : > { %v1108_v30 = vadd.s32 %v1106_v21, %v1100_v13  ;;  %v1088_v15 = vsel %vm1087_vm13, 1, %v2479_v2  ;;  %vm1109_vm14 = vc.u32 %v1107_v55, %v1103_v5  ;;  %v1080_v18 = vshrl.u32 %v1076_v14, 16 }
 0x162   : > { %v988_v17 = vmul.f32 %v987_v0, %v985_v35  ;;  %v1090_v1 = vadd.s32 %v1088_v15, %v1086_v52  ;;  %v1110_v20 = vsel %vm1109_vm14, 1, %v2479_v2  ;;  %vm1188_vm15 = vcmp.gt.s32.totalorder %v1187_v9, 0 }
 0x163   : > { %v1102_v50 = vshrl.u32 %v1098_v6, 16  ;;  %v1112_v37 = vadd.s32 %v1110_v20, %v1108_v30  ;;  %v1189_v43 = vsel %vm1188_vm15, %v1187_v9, 0  ;;  %v994_v16 = vsel %vm3248_vm10, 0, %v3240_v58 }
 0x164   : > { %v989_v38 = vxor.u32 2147483648, %v988_v17  ;;  %v1082_v59 = vshrl.u32 %v1077_v10, 16  ;;  %v1091_v49 = vadd.s32 %v1090_v1, %v1080_v18  ;;  %v1191_v3 = vand.u32 31, %v1189_v43 }
 0x165   : > { %v1061_v14 = vsel %vm1055_vm8, %v1058_v40, %v1060_v63  ;;  %v1104_v28 = vshrl.u32 %v1099_v53, 16  ;;  %v1113_v34 = vadd.s32 %v1112_v37, %v1102_v50  ;;  %v3273_v24 = vadd.s32 %v1107_v55, %v1103_v5 }
 0x166   : > { %v990_v45 = vsel %vm869_vm4, %v989_v38, %v988_v17  ;;  %v3271_v32 = vadd.s32 %v1091_v49, %v1082_v59  ;;  %v3275_v58 = vsub.s32 32, %v1191_v3  ;;  %v862_v10 = vmul.f32 %v856_v61, %v2637_v22 }
 0x167   : > { %v993_v6 = vsel %vm3248_vm10, %v2997_v39, %v990_v45  ;;  %v1114_v56 = vadd.s32 %v1113_v34, %v1104_v28  ;;  %v1185_v27 = vor.u32 8388608, %v3168_v60  ;;  %v1011_v40 = vadd.s32 3, %v994_v16 }
 0x168   : > { %v995_v23 = vmul.f32 %v993_v6, %v993_v6  ;;  %v1115_v53 = vmul.u32 %v3163_v36, %v1061_v14  ;;  %vm1117_vm0 = vc.u32 %v3271_v32, %v3273_v24  ;;  %v3284_v41 = vshrl.u32 %v1189_v43, 5 }
 0x169   : > { %v1118_v7 = vadd.s32 1, %v1114_v56  ;;  %v1195_v0 = vshrl.u32 %v2481_v44, %v3275_v58  ;;  %v1198_v12 = vshrl.u32 %v2482_v48, %v3275_v58  ;;  %v1201_v61 = vshrl.u32 %v2483_v51, %v3275_v58 }
 0x16a   : > { %v996_v26 = vmul.f32 -0.001358992, %v995_v23  ;;  %v1003_v31 = vmul.f32 -0.00019511016, %v995_v23  ;;  %v1203_v60 = vshll.u32 %v2483_v51, %v1191_v3  ;;  %v1204_v36 = vshrl.u32 %v2484_v54, %v3275_v58 }
 0x16b   : > { %v1119_v19 = vsel %vm1117_vm0, %v1118_v7, %v1114_v56  ;;  %v1194_v5 = vshll.u32 %v2480_v42, %v1191_v3  ;;  %v1197_v29 = vshll.u32 %v2481_v44, %v1191_v3  ;;  %v1200_v21 = vshll.u32 %v2482_v48, %v1191_v3 }
 0x16c   : > { %v997_v47 = vadd.f32 0.041655596, %v996_v26  ;;  %v1004_v13 = vadd.f32 0.008332121, %v1003_v31  ;;  %v1120_v35 = vadd.s32 %v1119_v19, %v1115_v53  ;;  %v1205_v55 = vor.u32 %v1204_v36, %v1203_v60 }
 0x16d   : > { %v1206_v9 = vshll.u32 %v2484_v54, %v1191_v3  ;;  %v1207_v17 = vshrl.u32 %v2485_v57, %v3275_v58  ;;  %v3301_v15 = vor.u32 %v1195_v0, %v1194_v5  ;;  %v3303_v18 = vor.u32 %v1198_v12, %v1197_v29 }
 0x16e   : > { %v998_v52 = vmul.f32 %v997_v47, %v995_v23  ;;  %v1005_v30 = vmul.f32 %v1004_v13, %v995_v23  ;;  %v1121_v63 = vadd.s32 536870912, %v1120_v35  ;;  %v3305_v1 = vor.u32 %v1201_v61, %v1200_v21 }
 0x16f   : > { %v1208_v50 = vor.u32 %v1207_v17, %v1206_v9  ;;  %vm1212_vm1 = vcmp.lt.s32.totalorder %v3284_v41, 4  ;;  %v3309_v37 = vadd.f32 %v862_v10, %v2644_v33  ;;  %v1012_v43 = vand.u32 3, %v1011_v40 }
 0x170   : > { %v999_v20 = vadd.f32 -0.4999988, %v998_v52  ;;  %v1006_v38 = vadd.f32 -0.16666654, %v1005_v30  ;;  %v3311_v16 = vshrl.u32 %v1121_v63, 30  ;;  %vm1209_vm2 = vcmp.lt.s32.totalorder %v3284_v41, 1 }
 0x171   : > { %v1218_v59 = vsel %vm1212_vm1, %v1205_v55, 920167782  ;;  %vm1211_vm3 = vcmp.lt.s32.totalorder %v3284_v41, 3  ;;  %v1217_v14 = vsel %vm1209_vm2, %v3301_v15, %v3303_v18  ;;  %v3325_v34 = vshll.u32 %v1185_v27, 8 }
 0x172   : > { %v1000_v49 = vmul.f32 %v999_v20, %v995_v23  ;;  %v1007_v3 = vmul.f32 %v1006_v38, %v995_v23  ;;  %v1123_v45 = vshll.u32 %v3311_v16, 30  ;;  %v1219_v28 = vsel %vm1211_vm3, %v3305_v1, %v1218_v59 }
 0x173   : > { %v1221_v23 = vsel %vm1209_vm2, %v3303_v18, %v3305_v1  ;;  %v1222_v40 = vsel %vm1212_vm1, %v1208_v50, 1326507024  ;;  %vm1013_vm4 = vcmp.lt.s32.totalorder %v1012_v43, 2  ;;  %vm1210_vm5 = vcmp.lt.s32.totalorder %v3284_v41, 2 }
 0x174   : > { %v1001_v10 = vadd.f32 1.0, %v1000_v49  ;;  %v1008_v56 = vadd.f32 1.0, %v1007_v3  ;;  %v1124_v53 = vsub.s32 %v1120_v35, %v1123_v45  ;;  %v1223_v26 = vsel %vm1211_vm3, %v1205_v55, %v1222_v40 }
 0x175   : > { %v1220_v7 = vsel %vm1210_vm5, %v1217_v14, %v1219_v28  ;;  %v1224_v0 = vsel %vm1210_vm5, %v1221_v23, %v1223_v26  ;;  %vm1017_vm6 = vcmp.eq.s32.totalorder %v1012_v43, 2  ;;  %v1226_v36 = vand.u32 65535, %v3325_v34 }
 0x176   : > { %v1009_v31 = vmul.f32 %v1008_v56, %v993_v6  ;;  %v1018_v27 = vxor.u32 2147483648, %v1001_v10  ;;  %vm1125_vm7 = vcmp.lt.s32.totalorder %v1124_v53, 0  ;;  %v1126_v12 = vsub.s32 0, %v1124_v53 }
 0x177   : > { %v1228_v61 = vand.u32 65535, %v1224_v0  ;;  %v1227_v47 = vshrl.u32 %v3325_v34, 16  ;;  %v1229_v13 = vshrl.u32 %v1224_v0, 16  ;;  %vm1014_vm8 = vcmp.eq.s32.totalorder %v1012_v43, 0 }
 0x178   : > { %v1015_v60 = vxor.u32 2147483648, %v1009_v31  ;;  %v1019_v19 = vsel %vm1017_vm6, %v1018_v27, %v1009_v31  ;;  %v1127_v6 = vsel %vm1125_vm7, %v1126_v12, %v1124_v53  ;;  %v1251_v5 = vshrl.u32 %v1220_v7, 16 }
 0x179   : > { %v1128_v29 = vclz %v1127_v6  ;;  %v1231_v21 = vmul.u32 %v1229_v13, %v1226_v36  ;;  %v1232_v55 = vmul.u32 %v1228_v61, %v1227_v47  ;;  %vm1010_vm9 = vweird.f32 %v2997_v39 }
 0x17a   : > { %v1016_v35 = vsel %vm1014_vm8, %v1001_v10, %v1015_v60  ;;  %v1250_v30 = vand.u32 65535, %v1220_v7  ;;  %v1230_v63 = vmul.u32 %v1228_v61, %v1226_v36  ;;  %v1116_v38 = vadd.s32 %v3273_v24, %v3271_v32 }
 0x17b   : > { %v1020_v52 = vsel %vm1013_vm4, %v1016_v35, %v1019_v19  ;;  %v2273_v17 = vadd.s32 4294967294, %v1128_v29  ;;  %v1234_v20 = vshll.u32 %v1231_v21, 16  ;;  %v1233_v50 = vmul.u32 %v1229_v13, %v1227_v47 }
 0x17c   : > { %v1021_v9 = vsel %vm1010_vm9, nan, %v1020_v52  ;;  %v1253_v59 = vmul.u32 %v1251_v5, %v1226_v36  ;;  %v1332_v49 = vand.u32 2147483647, %v3309_v37  ;;  %v1236_v3 = vshll.u32 %v1232_v55, 16 }
 0x17d   : > { %1487 = vst [vmem:[#allocation2 + $0x50] sm:$0xff] %v1021_v9  ;;  %vm2274_vm10 = vcmp.lt.s32.totalorder %v2273_v17, 0  ;;  %vm1238_vm11 = vc.u32 %v1230_v63, %v1234_v20  ;;  %v1240_v45 = vadd.s32 %v1234_v20, %v1230_v63  ;;  %v1254_v14 = vmul.u32 %v1250_v30, %v1227_v47 }
 0x17e   : > { %v1131_v39 = vsel %vm2274_vm10, 0, %v2273_v17  ;;  %v1239_v43 = vsel %vm1238_vm11, 1, %v2479_v2  ;;  %v1256_v28 = vshll.u32 %v1253_v59, 16  ;;  %vm1024_vm12 = vcmp.lt.s32.totalorder %v3044_v4, 0 }
 0x17f   : > { %v1132_v10 = vsub.s32 32, %v1131_v39  ;;  %v1136_v56 = vsub.s32 4294967266, %v1131_v39  ;;  %v1241_v23 = vadd.s32 %v1239_v43, %v1233_v50  ;;  %v1252_v32 = vmul.u32 %v1250_v30, %v1226_v36 }
 0x180   : > { %v1133_v24 = vshll.u32 %v1124_v53, %v1131_v39  ;;  %v1235_v40 = vshrl.u32 %v1231_v21, 16  ;;  %vm1242_vm13 = vc.u32 %v1240_v45, %v1236_v3  ;;  %v1255_v26 = vmul.u32 %v1251_v5, %v1227_v47 }
 0x181   : > { %v1134_v31 = vshrl.u32 %v1116_v38, %v1132_v10  ;;  %v1137_v27 = vadd.s32 127, %v1136_v56  ;;  %v1243_v7 = vsel %vm1242_vm13, 1, %v2479_v2  ;;  %vm1260_vm14 = vc.u32 %v1252_v32, %v1256_v28 }
 0x182   : > { %v1245_v0 = vadd.s32 %v1243_v7, %v1241_v23  ;;  %v1258_v12 = vshll.u32 %v1254_v14, 16  ;;  %v1261_v61 = vsel %vm1260_vm14, 1, %v2479_v2  ;;  %v1262_v60 = vadd.s32 %v1256_v28, %v1252_v32  ;;  %v3371_v28 = vld [vmem:[%s2591_s11 + $0x2] ss:$4 sm:$0x3] }
 0x183   : > { %v1135_v13 = vor.u32 %v1134_v31, %v1133_v24  ;;  %v1138_v19 = vshll.u32 %v1137_v27, 23  ;;  %v1214_v36 = vsel %vm1212_vm1, %v3305_v1, 2102212464  ;;  %v1263_v53 = vadd.s32 %v1261_v61, %v1255_v26 }
 0x184   : > { %v1146_v6 = vsub.s32 4, %v3311_v16  ;;  %v1193_v47 = vshrl.u32 %v2480_v42, %v3275_v58  ;;  %v1246_v5 = vadd.s32 %v1245_v0, %v1235_v40  ;;  %vm1264_vm15 = vc.u32 %v1262_v60, %v1258_v12 }
 0x185   : > { %v1139_v35 = vor.u32 4788187, %v1138_v19  ;;  %v1237_v29 = vshrl.u32 %v1232_v55, 16  ;;  %v1265_v21 = vsel %vm1264_vm15, 1, %v2479_v2  ;;  %v1335_v52 = vand.u32 2139095040, %v3309_v37 }
 0x186   : > { %v1213_v30 = vsel %vm1209_vm2, %v1193_v47, %v3301_v15  ;;  %v1215_v1 = vsel %vm1211_vm3, %v3303_v18, %v1214_v36  ;;  %v1257_v9 = vshrl.u32 %v1253_v59, 16  ;;  %v1267_v17 = vadd.s32 %v1265_v21, %v1263_v53 }
 0x187   : > { %v1140_v58 = vand.u32 2147483647, %v1139_v35  ;;  %v1142_v63 = vcvt.s32.f32 %v1135_v13  ;;  %v1247_v20 = vadd.s32 %v1246_v5, %v1237_v29  ;;  %v1336_v38 = vshrl.u32 %v1335_v52, 23 }
 0x188   : > { %v1147_v55 = vsel %vm1024_vm12, %v1146_v6, %v3311_v16  ;;  %v1259_v50 = vshrl.u32 %v1254_v14, 16  ;;  %v1268_v3 = vadd.s32 %v1267_v17, %v1257_v9  ;;  %v1339_v45 = vand.u32 8388607, %v1332_v49 }
 0x189   : > { %v1143_v15 = vmul.f32 %v1142_v63, %v1140_v58  ;;  %v1266_v39 = vadd.s32 %v1262_v60, %v1258_v12  ;;  %v2278_v43 = vadd.s32 4294967169, %v1336_v38  ;;  %vm1023_vm0 = vcmp.le.f32.partialorder %v1022_v46, 0.7853982 }
 0x18a   : > { %v1216_v18 = vsel %vm1210_vm5, %v1213_v30, %v1215_v1  ;;  %v1269_v59 = vadd.s32 %v1268_v3, %v1259_v50  ;;  %v1149_v56 = vsel %vm1023_vm0, 0, %v1147_v55  ;;  %v1340_v23 = vor.u32 8388608, %v1339_v45 }
 0x18b   : > { %v1144_v10 = vxor.u32 2147483648, %v1143_v15  ;;  %vm1272_vm1 = vc.u32 %v1247_v20, %v1266_v39  ;;  %v1342_v16 = vadd.s32 1, %v2278_v43  ;;  %v1494_v32 = vperm.slane %v3371_v28, 0 }
 0x18c   : > { %v1273_v14 = vadd.s32 1, %v1269_v59  ;;  %v1270_v40 = vmul.u32 %v3325_v34, %v1216_v18  ;;  %v1166_v26 = vadd.s32 3, %v1149_v56  ;;  %v3382_v12 = vshll.u32 %v1340_v23, 8 }
 0x18d   : > { %v1145_v24 = vsel %vm1024_vm12, %v1144_v10, %v1143_v15  ;;  %vm1343_vm2 = vcmp.gt.s32.totalorder %v1342_v16, 0  ;;  %v1495_v61 = vperm.slane %v3371_v28, 1  ;;  %v1498_v60 = vmul.f32 %v1494_v32, %v2615_v8 }
 0x18e   : > { %v1148_v46 = vsel %vm1023_vm0, %v3044_v4, %v1145_v24  ;;  %v1274_v41 = vsel %vm1272_vm1, %v1273_v14, %v1269_v59  ;;  %v1344_v31 = vsel %vm1343_vm2, %v1342_v16, 0  ;;  %v3388_v36 = vand.u32 3, %v1166_v26 }
 0x18f   : > { %v1150_v27 = vmul.f32 %v1148_v46, %v1148_v46  ;;  %v1275_v7 = vadd.s32 %v1274_v41, %v1270_v40  ;;  %v1346_v0 = vand.u32 31, %v1344_v31  ;;  %vm1179_vm3 = vcmp.lt.s32.totalorder %v3144_v25, 0 }
 0x190   : > { %v3393_v35 = vadd.s32 %v1266_v39, %v1247_v20  ;;  %v3396_v29 = vand.u32 65535, %v3382_v12  ;;  %v3401_v21 = vmul.f32 %v1495_v61, %v2615_v8  ;;  %v3404_v52 = vadd.f32 %v1498_v60, %v2621_v11 }
 0x191   : > { %v1151_v13 = vmul.f32 -0.001358992, %v1150_v27  ;;  %v1158_v19 = vmul.f32 -0.00019511016, %v1150_v27  ;;  %v1276_v34 = vadd.s32 536870912, %v1275_v7  ;;  %v3390_v53 = vsub.s32 32, %v1346_v0 }
 0x192   : > { %v3406_v17 = vshrl.u32 %v1344_v31, 5  ;;  %vm1172_vm4 = vcmp.eq.s32.totalorder %v3388_v36, 2  ;;  %v1349_v58 = vshll.u32 %v2480_v42, %v1346_v0  ;;  %v1352_v20 = vshll.u32 %v2481_v44, %v1346_v0 }
 0x193   : > { %v1152_v6 = vadd.f32 0.041655596, %v1151_v13  ;;  %v1159_v47 = vadd.f32 0.008332121, %v1158_v19  ;;  %v1277_v5 = vshrl.u32 %v1276_v34, 30  ;;  %v1350_v63 = vshrl.u32 %v2481_v44, %v3390_v53 }
 0x194   : > { %v1353_v8 = vshrl.u32 %v2482_v48, %v3390_v53  ;;  %v1359_v3 = vshrl.u32 %v2484_v54, %v3390_v53  ;;  %vm1169_vm5 = vcmp.eq.s32.totalorder %v3388_v36, 0  ;;  %v1356_v15 = vshrl.u32 %v2483_v51, %v3390_v53 }
 0x195   : > { %v1153_v30 = vmul.f32 %v1152_v6, %v1150_v27  ;;  %v1160_v1 = vmul.f32 %v1159_v47, %v1150_v27  ;;  %v1278_v9 = vshll.u32 %v1277_v5, 30  ;;  %v1301_v45 = vsub.s32 4, %v1277_v5 }
 0x196   : > { %v1358_v39 = vshll.u32 %v2483_v51, %v1346_v0  ;;  %v1362_v43 = vshrl.u32 %v2485_v57, %v3390_v53  ;;  %vm1168_vm6 = vcmp.lt.s32.totalorder %v3388_v36, 2  ;;  %vm1165_vm8 = vweird.f32 %v3044_v4 }
 0x197   : > { %v1154_v38 = vadd.f32 -0.4999988, %v1153_v30  ;;  %v1161_v55 = vadd.f32 -0.16666654, %v1160_v1  ;;  %v3415_v50 = vsub.s32 %v1275_v7, %v1278_v9  ;;  %v3429_v56 = vor.u32 %v1350_v63, %v1349_v58 }
 0x198   : > { %v3431_v16 = vor.u32 %v1353_v8, %v1352_v20  ;;  %v1355_v14 = vshll.u32 %v2482_v48, %v1346_v0  ;;  %v1361_v23 = vshll.u32 %v2484_v54, %v1346_v0  ;;  %v1360_v41 = vor.u32 %v1359_v3, %v1358_v39 }
 0x199   : > { %v1155_v18 = vmul.f32 %v1154_v38, %v1150_v27  ;;  %v1162_v59 = vmul.f32 %v1161_v55, %v1150_v27  ;;  %vm1280_vm7 = vcmp.lt.s32.totalorder %v3415_v50, 0  ;;  %v1281_v10 = vsub.s32 0, %v3415_v50 }
 0x19a   : > { %v3436_v27 = vor.u32 %v1356_v15, %v1355_v14  ;;  %v1363_v7 = vor.u32 %v1362_v43, %v1361_v23  ;;  %v1506_v60 = vand.u32 2147483647, %v3404_v52  ;;  %v3441_v34 = vsel %vm1179_vm3, %v1301_v45, %v1277_v5 }
 0x19b   : > { %v1156_v24 = vadd.f32 1.0, %v1155_v18  ;;  %v1163_v40 = vadd.f32 1.0, %v1162_v59  ;;  %v1282_v26 = vsel %vm1280_vm7, %v1281_v10, %v3415_v50  ;;  %vm1364_vm9 = vcmp.lt.s32.totalorder %v3406_v17, 1 }
 0x19c   : > { %v1283_v31 = vclz %v1282_v26  ;;  %vm3446_vm10 = vcmp.le.f32.partialorder %v1177_v62, 0.7853982  ;;  %vm1365_vm11 = vcmp.lt.s32.totalorder %v3406_v17, 2  ;;  %vm1367_vm12 = vcmp.lt.s32.totalorder %v3406_v17, 4 }
 0x19d   : > { %v1164_v13 = vmul.f32 %v1163_v40, %v1148_v46  ;;  %v1173_v19 = vxor.u32 2147483648, %v1156_v24  ;;  %v1372_v46 = vsel %vm1364_vm9, %v3429_v56, %v3431_v16  ;;  %vm1366_vm13 = vcmp.lt.s32.totalorder %v3406_v17, 3 }
 0x19e   : > { %v2276_v6 = vadd.s32 4294967294, %v1283_v31  ;;  %v1373_v62 = vsel %vm1367_vm12, %v1360_v41, 920167782  ;;  %v1376_v1 = vsel %vm1364_vm9, %v3431_v16, %v3436_v27  ;;  %v1377_v9 = vsel %vm1367_vm12, %v1363_v7, 1326507024 }
 0x19f   : > { %v1170_v47 = vxor.u32 2147483648, %v1164_v13  ;;  %v1174_v5 = vsel %vm1172_vm4, %v1173_v19, %v1164_v13  ;;  %v1374_v30 = vsel %vm1366_vm13, %v3436_v27, %v1373_v62  ;;  %v1378_v8 = vsel %vm1366_vm13, %v1360_v41, %v1377_v9 }
 0x1a0   : > { %vm2277_vm14 = vcmp.lt.s32.totalorder %v2276_v6, 0  ;;  %v1375_v20 = vsel %vm1365_vm11, %v1372_v46, %v1374_v30  ;;  %v1379_v39 = vsel %vm1365_vm11, %v1376_v1, %v1378_v8  ;;  %v1382_v36 = vshrl.u32 %v3382_v12, 16 }
 0x1a1   : > { %v1171_v58 = vsel %vm1169_vm5, %v1156_v24, %v1170_v47  ;;  %v1286_v63 = vsel %vm2277_vm14, 0, %v2276_v6  ;;  %v1405_v43 = vand.u32 65535, %v1375_v20  ;;  %v1406_v18 = vshrl.u32 %v1375_v20, 16 }
 0x1a2   : > { %v1175_v38 = vsel %vm1168_vm6, %v1171_v58, %v1174_v5  ;;  %v1287_v55 = vsub.s32 32, %v1286_v63  ;;  %v1288_v3 = vshll.u32 %v3415_v50, %v1286_v63  ;;  %v1291_v45 = vsub.s32 4294967266, %v1286_v63 }
 0x1a3   : > { %v1176_v15 = vsel %vm1165_vm8, nan, %v1175_v38  ;;  %v1383_v14 = vand.u32 65535, %v1379_v39  ;;  %v1384_v23 = vshrl.u32 %v1379_v39, 16  ;;  %v1408_v24 = vmul.u32 %v1406_v18, %v3396_v29 }
 0x1a4   : > { %v1289_v59 = vshrl.u32 %v3393_v35, %v1287_v55  ;;  %v1292_v10 = vadd.s32 127, %v1291_v45  ;;  %1488 = vst [vmem:[#allocation2 + $0x20] sm:$0xff] %v1176_v15  ;;  %v1509_v50 = vand.u32 2139095040, %v3404_v52  ;;  %v3489_v4 = vand.u32 8388607, %v1506_v60 }
 0x1a5   : > { %v1348_v41 = vshrl.u32 %v2480_v42, %v3390_v53  ;;  %v1386_v35 = vmul.u32 %v1384_v23, %v3396_v29  ;;  %v1304_v31 = vsel %vm3446_vm10, 0, %v3441_v34  ;;  %v1387_v7 = vmul.u32 %v1383_v14, %v1382_v36 }
 0x1a6   : > { %v1290_v40 = vor.u32 %v1289_v59, %v1288_v3  ;;  %v1293_v26 = vshll.u32 %v1292_v10, 23  ;;  %v1409_v13 = vmul.u32 %v1405_v43, %v1382_v36  ;;  %v1411_v19 = vshll.u32 %v1408_v24, 16 }
 0x1a7   : > { %v1385_v46 = vmul.u32 %v1383_v14, %v3396_v29  ;;  %v1389_v47 = vshll.u32 %v1386_v35, 16  ;;  %v1407_v5 = vmul.u32 %v1405_v43, %v3396_v29  ;;  %v1388_v30 = vmul.u32 %v1384_v23, %v1382_v36 }
 0x1a8   : > { %v1294_v6 = vor.u32 4788187, %v1293_v26  ;;  %v1297_v62 = vcvt.s32.f32 %v1290_v40  ;;  %v1391_v1 = vshll.u32 %v1387_v7, 16  ;;  %v1410_v9 = vmul.u32 %v1406_v18, %v1382_v36 }
 0x1a9   : > { %vm1393_vm15 = vc.u32 %v1385_v46, %v1389_v47  ;;  %v1395_v58 = vadd.s32 %v1389_v47, %v1385_v46  ;;  %vm1415_vm0 = vc.u32 %v1407_v5, %v1411_v19  ;;  %v1413_v34 = vshll.u32 %v1409_v13, 16 }
 0x1aa   : > { %v1295_v53 = vand.u32 2147483647, %v1294_v6  ;;  %v1394_v63 = vsel %vm1393_vm15, 1, %v2479_v2  ;;  %v1416_v20 = vsel %vm1415_vm0, 1, %v2479_v2  ;;  %v1417_v8 = vadd.s32 %v1411_v19, %v1407_v5 }
 0x1ab   : > { %v1396_v55 = vadd.s32 %v1394_v63, %v1388_v30  ;;  %vm1397_vm1 = vc.u32 %v1395_v58, %v1391_v1  ;;  %v1418_v3 = vadd.s32 %v1416_v20, %v1410_v9  ;;  %v1369_v29 = vsel %vm1367_vm12, %v3436_v27, 2102212464 }
 0x1ac   : > { %v1298_v38 = vmul.f32 %v1297_v62, %v1295_v53  ;;  %v1398_v45 = vsel %vm1397_vm1, 1, %v2479_v2  ;;  %vm1419_vm2 = vc.u32 %v1417_v8, %v1413_v34  ;;  %v1510_v15 = vshrl.u32 %v1509_v50, 23 }
 0x1ad   : > { %v1390_v43 = vshrl.u32 %v1386_v35, 16  ;;  %v1400_v18 = vadd.s32 %v1398_v45, %v1396_v55  ;;  %v1420_v59 = vsel %vm1419_vm2, 1, %v2479_v2  ;;  %v1368_v10 = vsel %vm1364_vm9, %v1348_v41, %v3429_v56 }
 0x1ae   : > { %v1299_v39 = vxor.u32 2147483648, %v1298_v38  ;;  %v1412_v14 = vshrl.u32 %v1408_v24, 16  ;;  %v1422_v23 = vadd.s32 %v1420_v59, %v1418_v3  ;;  %v2282_v36 = vadd.s32 4294967169, %v1510_v15 }
 0x1af   : > { %v1370_v27 = vsel %vm1366_vm13, %v3431_v16, %v1369_v29  ;;  %v1392_v50 = vshrl.u32 %v1387_v7, 16  ;;  %v1401_v26 = vadd.s32 %v1400_v18, %v1390_v43  ;;  %v1414_v19 = vshrl.u32 %v1409_v13, 16 }
 0x1b0   : > { %v1300_v40 = vsel %vm1179_vm3, %v1299_v39, %v1298_v38  ;;  %v1423_v6 = vadd.s32 %v1422_v23, %v1412_v14  ;;  %v1516_v46 = vadd.s32 1, %v2282_v36  ;;  %v3519_v41 = vadd.s32 %v1417_v8, %v1413_v34 }
 0x1b1   : > { %v1303_v35 = vsel %vm3446_vm10, %v3144_v25, %v1300_v40  ;;  %v3517_v24 = vadd.s32 %v1401_v26, %v1392_v50  ;;  %v1321_v47 = vadd.s32 3, %v1304_v31  ;;  %v1371_v5 = vsel %vm1365_vm11, %v1368_v10, %v1370_v27 }
 0x1b2   : > { %v1305_v56 = vmul.f32 %v1303_v35, %v1303_v35  ;;  %v1424_v62 = vadd.s32 %v1423_v6, %v1414_v19  ;;  %vm1517_vm3 = vcmp.gt.s32.totalorder %v1516_v46, 0  ;;  %v3527_v13 = vadd.f32 %v3401_v21, %v2621_v11 }
 0x1b3   : > { %vm1427_vm4 = vc.u32 %v3517_v24, %v3519_v41  ;;  %v1514_v30 = vor.u32 8388608, %v3489_v4  ;;  %v1518_v1 = vsel %vm1517_vm3, %v1516_v46, 0  ;;  %v1425_v17 = vmul.u32 %v3382_v12, %v1371_v5 }
 0x1b4   : > { %v1306_v16 = vmul.f32 -0.001358992, %v1305_v56  ;;  %v1313_v7 = vmul.f32 -0.00019511016, %v1305_v56  ;;  %v1428_v0 = vadd.s32 1, %v1424_v62  ;;  %v1520_v53 = vand.u32 31, %v1518_v1 }
 0x1b5   : > { %v1322_v58 = vand.u32 3, %v1321_v47  ;;  %v3536_v11 = vmul.f32 %v1494_v32, %v2637_v22  ;;  %v3538_v21 = vshll.u32 %v1514_v30, 8  ;;  %v1664_v12 = vand.u32 2139095040, %v3527_v13 }
 0x1b6   : > { %v1307_v9 = vadd.f32 0.041655596, %v1306_v16  ;;  %v1314_v31 = vadd.f32 0.008332121, %v1313_v7  ;;  %v1429_v63 = vsel %vm1427_vm4, %v1428_v0, %v1424_v62  ;;  %v3531_v38 = vsub.s32 32, %v1520_v53 }
 0x1b7   : > { %v1430_v8 = vadd.s32 %v1429_v63, %v1425_v17  ;;  %vm1324_vm5 = vcmp.eq.s32.totalorder %v1322_v58, 0  ;;  %vm1327_vm6 = vcmp.eq.s32.totalorder %v1322_v58, 2  ;;  %v3541_v29 = vshrl.u32 %v1518_v1, 5 }
 0x1b8   : > { %v1308_v34 = vmul.f32 %v1307_v9, %v1305_v56  ;;  %v1315_v20 = vmul.f32 %v1314_v31, %v1305_v56  ;;  %v1524_v45 = vshrl.u32 %v2481_v44, %v3531_v38  ;;  %v1527_v15 = vshrl.u32 %v2482_v48, %v3531_v38 }
 0x1b9   : > { %v1431_v3 = vadd.s32 536870912, %v1430_v8  ;;  %v1533_v32 = vshrl.u32 %v2484_v54, %v3531_v38  ;;  %vm1323_vm7 = vcmp.lt.s32.totalorder %v1322_v58, 2  ;;  %v1530_v59 = vshrl.u32 %v2483_v51, %v3531_v38 }
 0x1ba   : > { %v1309_v4 = vadd.f32 -0.4999988, %v1308_v34  ;;  %v1316_v55 = vadd.f32 -0.16666654, %v1315_v20  ;;  %vm1320_vm8 = vweird.f32 %v3144_v25  ;;  %v1523_v10 = vshll.u32 %v2480_v42, %v1520_v53 }
 0x1bb   : > { %v1432_v18 = vshrl.u32 %v1431_v3, 30  ;;  %v1526_v14 = vshll.u32 %v2481_v44, %v1520_v53  ;;  %v1529_v23 = vshll.u32 %v2482_v48, %v1520_v53  ;;  %v1532_v36 = vshll.u32 %v2483_v51, %v1520_v53 }
 0x1bc   : > { %v1310_v39 = vmul.f32 %v1309_v4, %v1305_v56  ;;  %v1317_v43 = vmul.f32 %v1316_v55, %v1305_v56  ;;  %v1535_v26 = vshll.u32 %v2484_v54, %v1520_v53  ;;  %v1525_v19 = vor.u32 %v1524_v45, %v1523_v10 }
 0x1bd   : > { %v1433_v50 = vshll.u32 %v1432_v18, 30  ;;  %v1528_v6 = vor.u32 %v1527_v15, %v1526_v14  ;;  %v1534_v46 = vor.u32 %v1533_v32, %v1532_v36  ;;  %v1536_v56 = vshrl.u32 %v2485_v57, %v3531_v38 }
 0x1be   : > { %v1311_v40 = vadd.f32 1.0, %v1310_v39  ;;  %v1318_v27 = vadd.f32 1.0, %v1317_v43  ;;  %v1531_v16 = vor.u32 %v1530_v59, %v1529_v23  ;;  %vm1334_vm9 = vcmp.lt.s32.totalorder %v3309_v37, 0 }
 0x1bf   : > { %v1434_v62 = vsub.s32 %v1430_v8, %v1433_v50  ;;  %v1537_v7 = vor.u32 %v1536_v56, %v1535_v26  ;;  %vm1538_vm10 = vcmp.lt.s32.totalorder %v3541_v29, 1  ;;  %v1555_v0 = vand.u32 65535, %v3538_v21 }
 0x1c0   : > { %v1319_v47 = vmul.f32 %v1318_v27, %v1303_v35  ;;  %v1328_v5 = vxor.u32 2147483648, %v1311_v40  ;;  %v1661_v30 = vand.u32 2147483647, %v3527_v13  ;;  %vm1541_vm12 = vcmp.lt.s32.totalorder %v3541_v29, 4 }
 0x1c1   : > { %vm1435_vm11 = vcmp.lt.s32.totalorder %v1434_v62, 0  ;;  %v1436_v9 = vsub.s32 0, %v1434_v62  ;;  %vm1540_vm13 = vcmp.lt.s32.totalorder %v3541_v29, 3  ;;  %v1546_v35 = vsel %vm1538_vm10, %v1525_v19, %v1528_v6 }
 0x1c2   : > { %v1325_v1 = vxor.u32 2147483648, %v1319_v47  ;;  %v1547_v31 = vsel %vm1541_vm12, %v1534_v46, 920167782  ;;  %v1665_v17 = vshrl.u32 %v1664_v12, 23  ;;  %v1329_v63 = vsel %vm1327_vm6, %v1328_v5, %v1319_v47 }
 0x1c3   : > { %v1437_v34 = vsel %vm1435_vm11, %v1436_v9, %v1434_v62  ;;  %v1548_v20 = vsel %vm1540_vm13, %v1531_v16, %v1547_v31  ;;  %v1456_v55 = vsub.s32 4, %v1432_v18  ;;  %vm1539_vm14 = vcmp.lt.s32.totalorder %v3541_v29, 2 }
 0x1c4   : > { %v1326_v53 = vsel %vm1324_vm5, %v1311_v40, %v1325_v1  ;;  %v1438_v4 = vclz %v1437_v34  ;;  %v1549_v12 = vsel %vm1539_vm14, %v1546_v35, %v1548_v20  ;;  %v1550_v45 = vsel %vm1538_vm10, %v1528_v6, %v1531_v16 }
 0x1c5   : > { %v1330_v8 = vsel %vm1323_vm7, %v1326_v53, %v1329_v63  ;;  %v1551_v15 = vsel %vm1541_vm12, %v1537_v7, 1326507024  ;;  %v1426_v58 = vadd.s32 %v3519_v41, %v3517_v24  ;;  %v1556_v39 = vshrl.u32 %v3538_v21, 16 }
 0x1c6   : > { %v1331_v3 = vsel %vm1320_vm8, nan, %v1330_v8  ;;  %v2279_v32 = vadd.s32 4294967294, %v1438_v4  ;;  %v3588_v25 = vand.u32 8388607, %v1661_v30  ;;  %v1522_v43 = vshrl.u32 %v2480_v42, %v3531_v38 }
 0x1c7   : > { %1489 = vst [vmem:[#allocation2 + $0x8] sm:$0xff] %v1331_v3  ;;  %v1552_v59 = vsel %vm1540_vm13, %v1534_v46, %v1551_v15  ;;  %v1580_v10 = vshrl.u32 %v1549_v12, 16  ;;  %v2285_v14 = vadd.s32 4294967169, %v1665_v17  ;;  %v1543_v24 = vsel %vm1541_vm12, %v1531_v16, 2102212464 }
 0x1c8   : > { %vm2280_vm15 = vcmp.lt.s32.totalorder %v2279_v32, 0  ;;  %v1553_v41 = vsel %vm1539_vm14, %v1550_v45, %v1552_v59  ;;  %v1579_v23 = vand.u32 65535, %v1549_v12  ;;  %v3600_v40 = vsel %vm1334_vm9, %v1456_v55, %v1432_v18 }
 0x1c9   : > { %v1441_v36 = vsel %vm2280_vm15, 0, %v2279_v32  ;;  %v1557_v27 = vand.u32 65535, %v1553_v41  ;;  %v1558_v38 = vshrl.u32 %v1553_v41, 16  ;;  %v1542_v46 = vsel %vm1538_vm10, %v1522_v43, %v1525_v19 }
 0x1ca   : > { %v1442_v50 = vsub.s32 32, %v1441_v36  ;;  %v1446_v26 = vsub.s32 4294967266, %v1441_v36  ;;  %v1582_v56 = vmul.u32 %v1580_v10, %v1555_v0  ;;  %v1544_v47 = vsel %vm1540_vm13, %v1528_v6, %v1543_v24 }
 0x1cb   : > { %v1560_v5 = vmul.u32 %v1558_v38, %v1555_v0  ;;  %v1561_v16 = vmul.u32 %v1557_v27, %v1556_v39  ;;  %v1671_v7 = vadd.s32 1, %v2285_v14  ;;  %v1443_v1 = vshll.u32 %v1434_v62, %v1441_v36 }
 0x1cc   : > { %v1444_v9 = vshrl.u32 %v1426_v58, %v1442_v50  ;;  %v1447_v35 = vadd.s32 127, %v1446_v26  ;;  %v1583_v31 = vmul.u32 %v1579_v23, %v1556_v39  ;;  %vm3608_vm0 = vcmp.le.f32.partialorder %v1332_v49, 0.7853982 }
 0x1cd   : > { %v1559_v17 = vmul.u32 %v1557_v27, %v1555_v0  ;;  %v1562_v53 = vmul.u32 %v1558_v38, %v1556_v39  ;;  %v1563_v19 = vshll.u32 %v1560_v5, 16  ;;  %v1581_v63 = vmul.u32 %v1579_v23, %v1555_v0 }
 0x1ce   : > { %v1445_v34 = vor.u32 %v1444_v9, %v1443_v1  ;;  %v1448_v20 = vshll.u32 %v1447_v35, 23  ;;  %v1584_v6 = vmul.u32 %v1580_v10, %v1556_v39  ;;  %v1585_v8 = vshll.u32 %v1582_v56, 16 }
 0x1cf   : > { %v1565_v4 = vshll.u32 %v1561_v16, 16  ;;  %vm1567_vm1 = vc.u32 %v1559_v17, %v1563_v19  ;;  %v1569_v62 = vadd.s32 %v1563_v19, %v1559_v17  ;;  %v1587_v55 = vshll.u32 %v1583_v31, 16 }
 0x1d0   : > { %v1449_v3 = vor.u32 4788187, %v1448_v20  ;;  %v1452_v12 = vcvt.s32.f32 %v1445_v34  ;;  %v1568_v45 = vsel %vm1567_vm1, 1, %v2479_v2  ;;  %vm1589_vm2 = vc.u32 %v1581_v63, %v1585_v8 }
 0x1d1   : > { %v1570_v49 = vadd.s32 %v1568_v45, %v1562_v53  ;;  %vm1571_vm3 = vc.u32 %v1569_v62, %v1565_v4  ;;  %v1590_v15 = vsel %vm1589_vm2, 1, %v2479_v2  ;;  %v1591_v58 = vadd.s32 %v1585_v8, %v1581_v63 }
 0x1d2   : > { %v1450_v32 = vand.u32 2147483647, %v1449_v3  ;;  %v1572_v0 = vsel %vm1571_vm3, 1, %v2479_v2  ;;  %v1592_v43 = vadd.s32 %v1590_v15, %v1584_v6  ;;  %vm1672_vm4 = vcmp.gt.s32.totalorder %v1671_v7, 0 }
 0x1d3   : > { %v1564_v39 = vshrl.u32 %v1560_v5, 16  ;;  %v1574_v59 = vadd.s32 %v1572_v0, %v1570_v49  ;;  %vm1593_vm5 = vc.u32 %v1591_v58, %v1587_v55  ;;  %v1673_v10 = vsel %vm1672_vm4, %v1671_v7, 0 }
 0x1d4   : > { %v1453_v14 = vmul.f32 %v1452_v12, %v1450_v32  ;;  %v1545_v24 = vsel %vm1539_vm14, %v1542_v46, %v1544_v47  ;;  %v1594_v41 = vsel %vm1593_vm5, 1, %v2479_v2  ;;  %v1675_v23 = vand.u32 31, %v1673_v10 }
 0x1d5   : > { %v1566_v36 = vshrl.u32 %v1561_v16, 16  ;;  %v1575_v27 = vadd.s32 %v1574_v59, %v1564_v39  ;;  %v1586_v38 = vshrl.u32 %v1582_v56, 16  ;;  %v1596_v50 = vadd.s32 %v1594_v41, %v1592_v43 }
 0x1d6   : > { %v1454_v26 = vxor.u32 2147483648, %v1453_v14  ;;  %v1459_v1 = vsel %vm3608_vm0, 0, %v3600_v40  ;;  %v1669_v5 = vor.u32 8388608, %v3588_v25  ;;  %v3622_v9 = vsub.s32 32, %v1675_v23 }
 0x1d7   : > { %v3624_v7 = vadd.s32 %v1575_v27, %v1566_v36  ;;  %v1588_v29 = vshrl.u32 %v1583_v31, 16  ;;  %v1597_v46 = vadd.s32 %v1596_v50, %v1586_v38  ;;  %v1599_v47 = vmul.u32 %v3538_v21, %v1545_v24 }
 0x1d8   : > { %v1455_v16 = vsel %vm1334_vm9, %v1454_v26, %v1453_v14  ;;  %v3629_v56 = vadd.s32 %v1591_v58, %v1587_v55  ;;  %v3631_v35 = vshrl.u32 %v1673_v10, 5  ;;  %v1681_v17 = vshll.u32 %v2481_v44, %v1675_v23 }
 0x1d9   : > { %v1458_v25 = vsel %vm3608_vm0, %v3309_v37, %v1455_v16  ;;  %v1598_v40 = vadd.s32 %v1597_v46, %v1588_v29  ;;  %v1682_v31 = vshrl.u32 %v2482_v48, %v3622_v9  ;;  %v1687_v53 = vshll.u32 %v2483_v51, %v1675_v23 }
 0x1da   : > { %v1460_v21 = vmul.f32 %v1458_v25, %v1458_v25  ;;  %vm1601_vm6 = vc.u32 %v3624_v7, %v3629_v56  ;;  %v1679_v19 = vshrl.u32 %v2481_v44, %v3622_v9  ;;  %v1685_v63 = vshrl.u32 %v2483_v51, %v3622_v9 }
 0x1db   : > { %v1602_v34 = vadd.s32 1, %v1598_v40  ;;  %v1688_v18 = vshrl.u32 %v2484_v54, %v3622_v9  ;;  %v1690_v20 = vshll.u32 %v2484_v54, %v1675_v23  ;;  %v1691_v6 = vshrl.u32 %v2485_v57, %v3622_v9 }
 0x1dc   : > { %v1461_v8 = vmul.f32 -0.001358992, %v1460_v21  ;;  %v1468_v4 = vmul.f32 -0.00019511016, %v1460_v21  ;;  %v1678_v62 = vshll.u32 %v2480_v42, %v1675_v23  ;;  %v1684_v55 = vshll.u32 %v2482_v48, %v1675_v23 }
 0x1dd   : > { %v1603_v3 = vsel %vm1601_vm6, %v1602_v34, %v1598_v40  ;;  %v3653_v12 = vor.u32 %v1682_v31, %v1681_v17  ;;  %v1689_v45 = vor.u32 %v1688_v18, %v1687_v53  ;;  %v1692_v49 = vor.u32 %v1691_v6, %v1690_v20 }
 0x1de   : > { %v1462_v15 = vadd.f32 0.041655596, %v1461_v8  ;;  %v1469_v58 = vadd.f32 0.008332121, %v1468_v4  ;;  %v1604_v32 = vadd.s32 %v1603_v3, %v1599_v47  ;;  %v1686_v0 = vor.u32 %v1685_v63, %v1684_v55 }
 0x1df   : > { %v1476_v43 = vadd.s32 3, %v1459_v1  ;;  %v1501_v39 = vmul.f32 %v1495_v61, %v2637_v22  ;;  %v3658_v59 = vor.u32 %v1679_v19, %v1678_v62  ;;  %v3660_v10 = vshll.u32 %v1669_v5, 8 }
 0x1e0   : > { %v1463_v14 = vmul.f32 %v1462_v15, %v1460_v21  ;;  %v1470_v24 = vmul.f32 %v1469_v58, %v1460_v21  ;;  %v1605_v41 = vadd.s32 536870912, %v1604_v32  ;;  %vm1696_vm7 = vcmp.lt.s32.totalorder %v3631_v35, 4 }
 0x1e1   : > { %vm1693_vm8 = vcmp.lt.s32.totalorder %v3631_v35, 1  ;;  %vm1695_vm9 = vcmp.lt.s32.totalorder %v3631_v35, 3  ;;  %v1702_v23 = vsel %vm1696_vm7, %v1689_v45, 920167782  ;;  %v1706_v28 = vsel %vm1696_vm7, %v1692_v49, 1326507024 }
 0x1e2   : > { %v1464_v22 = vadd.f32 -0.4999988, %v1463_v14  ;;  %v1471_v61 = vadd.f32 -0.16666654, %v1470_v24  ;;  %v3669_v36 = vshrl.u32 %v1605_v41, 30  ;;  %v1705_v27 = vsel %vm1693_vm8, %v3653_v12, %v1686_v0 }
 0x1e3   : > { %vm1694_vm10 = vcmp.lt.s32.totalorder %v3631_v35, 2  ;;  %v1701_v38 = vsel %vm1693_vm8, %v3658_v59, %v3653_v12  ;;  %v1707_v50 = vsel %vm1695_vm9, %v1689_v45, %v1706_v28  ;;  %v1703_v29 = vsel %vm1695_vm9, %v1686_v0, %v1702_v23 }
 0x1e4   : > { %v1465_v26 = vmul.f32 %v1464_v22, %v1460_v21  ;;  %v1472_v1 = vmul.f32 %v1471_v61, %v1460_v21  ;;  %v1607_v5 = vshll.u32 %v3669_v36, 30  ;;  %vm1475_vm11 = vweird.f32 %v3309_v37 }
 0x1e5   : > { %v1477_v46 = vand.u32 3, %v1476_v43  ;;  %v3687_v47 = vadd.f32 %v3536_v11, %v2644_v33  ;;  %v3690_v16 = vadd.f32 %v1501_v39, %v2644_v33  ;;  %v1708_v17 = vsel %vm1694_vm10, %v1705_v27, %v1707_v50 }
 0x1e6   : > { %v1466_v40 = vadd.f32 1.0, %v1465_v26  ;;  %v1473_v31 = vadd.f32 1.0, %v1472_v1  ;;  %v1608_v53 = vsub.s32 %v1604_v32, %v1607_v5  ;;  %v1710_v21 = vand.u32 65535, %v3660_v10 }
 0x1e7   : > { %v1704_v19 = vsel %vm1694_vm10, %v1701_v38, %v1703_v29  ;;  %v1711_v63 = vshrl.u32 %v3660_v10, 16  ;;  %v1712_v34 = vand.u32 65535, %v1708_v17  ;;  %v1713_v18 = vshrl.u32 %v1708_v17, 16 }
 0x1e8   : > { %v1474_v11 = vmul.f32 %v1473_v31, %v1458_v25  ;;  %v1483_v20 = vxor.u32 2147483648, %v1466_v40  ;;  %vm1609_vm12 = vcmp.lt.s32.totalorder %v1608_v53, 0  ;;  %v1610_v33 = vsub.s32 0, %v1608_v53 }
 0x1e9   : > { %vm1478_vm13 = vcmp.lt.s32.totalorder %v1477_v46, 2  ;;  %vm1479_vm14 = vcmp.eq.s32.totalorder %v1477_v46, 0  ;;  %vm1482_vm15 = vcmp.eq.s32.totalorder %v1477_v46, 2  ;;  %v1715_v6 = vmul.u32 %v1713_v18, %v1710_v21 }
 0x1ea   : > { %v1480_v8 = vxor.u32 2147483648, %v1474_v11  ;;  %v1611_v4 = vsel %vm1609_vm12, %v1610_v33, %v1608_v53  ;;  %v1677_v62 = vshrl.u32 %v2480_v42, %v3622_v9  ;;  %v1716_v55 = vmul.u32 %v1712_v34, %v1711_v63 }
 0x1eb   : > { %v1600_v3 = vadd.s32 %v3629_v56, %v3624_v7  ;;  %v1612_v45 = vclz %v1611_v4  ;;  %v1718_v49 = vshll.u32 %v1715_v6, 16  ;;  %v1734_v15 = vand.u32 65535, %v1704_v19 }
 0x1ec   : > { %v1481_v25 = vsel %vm1479_vm14, %v1466_v40, %v1480_v8  ;;  %v1484_v58 = vsel %vm1482_vm15, %v1483_v20, %v1474_v11  ;;  %v1714_v32 = vmul.u32 %v1712_v34, %v1710_v21  ;;  %v1735_v43 = vshrl.u32 %v1704_v19, 16 }
 0x1ed   : > { %v1485_v39 = vsel %vm1478_vm13, %v1481_v25, %v1484_v58  ;;  %v2283_v14 = vadd.s32 4294967294, %v1612_v45  ;;  %v1698_v24 = vsel %vm1696_vm7, %v1686_v0, 2102212464  ;;  %v1717_v41 = vmul.u32 %v1713_v18, %v1711_v63 }
 0x1ee   : > { %v1486_v9 = vsel %vm1475_vm11, nan, %v1485_v39  ;;  %v1720_v23 = vshll.u32 %v1716_v55, 16  ;;  %vm1722_vm0 = vc.u32 %v1714_v32, %v1718_v49  ;;  %v1724_v7 = vadd.s32 %v1718_v49, %v1714_v32 }
 0x1ef   : > { %1490 = vst [vmem:[#allocation2 + $0x38] sm:$0xff] %v1486_v9  ;;  %vm1508_vm1 = vcmp.lt.s32.totalorder %v3404_v52, 0  ;;  %vm2284_vm2 = vcmp.lt.s32.totalorder %v2283_v14, 0  ;;  %v1723_v56 = vsel %vm1722_vm0, 1, %v2479_v2  ;;  %v1737_v28 = vmul.u32 %v1735_v43, %v1710_v21 }
 0x1f0   : > { %v1816_v22 = vand.u32 2147483647, %v3687_v47  ;;  %v1615_v61 = vsel %vm2284_vm2, 0, %v2283_v14  ;;  %v1725_v27 = vadd.s32 %v1723_v56, %v1717_v41  ;;  %vm1726_vm3 = vc.u32 %v1724_v7, %v1720_v23 }
 0x1f1   : > { %v1738_v0 = vmul.u32 %v1734_v15, %v1711_v63  ;;  %v1616_v38 = vsub.s32 32, %v1615_v61  ;;  %v1620_v50 = vsub.s32 4294967266, %v1615_v61  ;;  %v1630_v37 = vsub.s32 4, %v3669_v36 }
 0x1f2   : > { %v1727_v26 = vsel %vm1726_vm3, 1, %v2479_v2  ;;  %v1719_v1 = vshrl.u32 %v1715_v6, 16  ;;  %v1736_v29 = vmul.u32 %v1734_v15, %v1710_v21  ;;  %v1740_v46 = vshll.u32 %v1737_v28, 16 }
 0x1f3   : > { %v1729_v5 = vadd.s32 %v1727_v26, %v1725_v27  ;;  %v1617_v17 = vshll.u32 %v1608_v53, %v1615_v61  ;;  %v1618_v40 = vshrl.u32 %v1600_v3, %v1616_v38  ;;  %v1621_v31 = vadd.s32 127, %v1620_v50 }
 0x1f4   : > { %v1739_v19 = vmul.u32 %v1735_v43, %v1711_v63  ;;  %v1742_v34 = vshll.u32 %v1738_v0, 16  ;;  %vm1744_vm4 = vc.u32 %v1736_v29, %v1740_v46  ;;  %v1746_v18 = vadd.s32 %v1740_v46, %v1736_v29 }
 0x1f5   : > { %v1819_v11 = vand.u32 2139095040, %v3687_v47  ;;  %v1619_v20 = vor.u32 %v1618_v40, %v1617_v17  ;;  %v1622_v33 = vshll.u32 %v1621_v31, 23  ;;  %v1730_v8 = vadd.s32 %v1729_v5, %v1719_v1 }
 0x1f6   : > { %v1745_v4 = vsel %vm1744_vm4, 1, %v2479_v2  ;;  %v1697_v6 = vsel %vm1693_vm8, %v1677_v62, %v3658_v59  ;;  %vm1748_vm5 = vc.u32 %v1746_v18, %v1742_v34  ;;  %v1823_v53 = vand.u32 8388607, %v1816_v22 }
 0x1f7   : > { %v1747_v21 = vadd.s32 %v1745_v4, %v1739_v19  ;;  %v1623_v63 = vor.u32 4788187, %v1622_v33  ;;  %v1721_v3 = vshrl.u32 %v1716_v55, 16  ;;  %v1749_v45 = vsel %vm1748_vm5, 1, %v2479_v2 }
 0x1f8   : > { %v1820_v49 = vshrl.u32 %v1819_v11, 23  ;;  %v1631_v15 = vsel %vm1508_vm1, %v1630_v37, %v3669_v36  ;;  %v1699_v25 = vsel %vm1695_vm9, %v3653_v12, %v1698_v24  ;;  %v1741_v58 = vshrl.u32 %v1737_v28, 16 }
 0x1f9   : > { %v1751_v59 = vadd.s32 %v1749_v45, %v1747_v21  ;;  %v1624_v62 = vand.u32 2147483647, %v1623_v63  ;;  %v1626_v32 = vcvt.s32.f32 %v1619_v20  ;;  %v1731_v43 = vadd.s32 %v1730_v8, %v1721_v3 }
 0x1fa   : > { %v2288_v39 = vadd.s32 4294967169, %v1820_v49  ;;  %vm3728_vm6 = vcmp.le.f32.partialorder %v1506_v60, 0.7853982  ;;  %v1743_v14 = vshrl.u32 %v1738_v0, 16  ;;  %v1824_v9 = vor.u32 8388608, %v1823_v53 }
 0x1fb   : > { %v1752_v41 = vadd.s32 %v1751_v59, %v1741_v58  ;;  %v1627_v36 = vmul.f32 %v1626_v32, %v1624_v62  ;;  %v1633_v23 = vsel %vm3728_vm6, 0, %v1631_v15  ;;  %v1750_v12 = vadd.s32 %v1746_v18, %v1742_v34 }
 0x1fc   : > { %v1826_v24 = vadd.s32 1, %v2288_v39  ;;  %v1700_v7 = vsel %vm1694_vm10, %v1697_v6, %v1699_v25  ;;  %v1650_v60 = vadd.s32 3, %v1633_v23  ;;  %v3736_v38 = vshll.u32 %v1824_v9, 8 }
 0x1fd   : > { %v1753_v56 = vadd.s32 %v1752_v41, %v1743_v14  ;;  %v1628_v28 = vxor.u32 2147483648, %v1627_v36  ;;  %vm1756_vm7 = vc.u32 %v1731_v43, %v1750_v12  ;;  %v1754_v50 = vmul.u32 %v3660_v10, %v1700_v7 }
 0x1fe   : > { %vm1827_vm8 = vcmp.gt.s32.totalorder %v1826_v24, 0  ;;  %v1974_v26 = vand.u32 2139095040, %v3690_v16  ;;  %v3749_v17 = vand.u32 3, %v1650_v60  ;;  %v3751_v40 = vadd.s32 %v1750_v12, %v1731_v43 }
 0x1ff   : > { %v1757_v61 = vadd.s32 1, %v1753_v56  ;;  %v1828_v27 = vsel %vm1827_vm8, %v1826_v24, 0  ;;  %v1629_v0 = vsel %vm1508_vm1, %v1628_v28, %v1627_v36  ;;  %v3754_v10 = vand.u32 65535, %v3736_v38 }
 0x200   : > { %v1830_v37 = vand.u32 31, %v1828_v27  ;;  %v3745_v35 = vsel %vm3728_vm6, %v3404_v52, %v1629_v0  ;;  %v1971_v31 = vand.u32 2147483647, %v3690_v16  ;;  %v1975_v11 = vshrl.u32 %v1974_v26, 23 }
 0x201   : > { %v1758_v1 = vsel %vm1756_vm7, %v1757_v61, %v1753_v56  ;;  %v1634_v5 = vmul.f32 %v3745_v35, %v3745_v35  ;;  %v3757_v20 = vshrl.u32 %v1828_v27, 5  ;;  %vm1656_vm9 = vcmp.eq.s32.totalorder %v3749_v17, 2 }
 0x202   : > { %v1759_v29 = vadd.s32 %v1758_v1, %v1754_v50  ;;  %v1831_v46 = vsub.s32 32, %v1830_v37  ;;  %v1833_v63 = vshll.u32 %v2480_v42, %v1830_v37  ;;  %v1836_v3 = vshll.u32 %v2481_v44, %v1830_v37 }
 0x203   : > { %v1635_v19 = vmul.f32 -0.001358992, %v1634_v5  ;;  %v1642_v34 = vmul.f32 -0.00019511016, %v1634_v5  ;;  %v1842_v49 = vshll.u32 %v2483_v51, %v1830_v37  ;;  %v1839_v62 = vshll.u32 %v2482_v48, %v1830_v37 }
 0x204   : > { %v1760_v18 = vadd.s32 536870912, %v1759_v29  ;;  %v1834_v33 = vshrl.u32 %v2481_v44, %v1831_v46  ;;  %v1837_v8 = vshrl.u32 %v2482_v48, %v1831_v46  ;;  %v1843_v4 = vshrl.u32 %v2484_v54, %v1831_v46 }
 0x205   : > { %v1636_v6 = vadd.f32 0.041655596, %v1635_v19  ;;  %v1643_v21 = vadd.f32 0.008332121, %v1642_v34  ;;  %v1840_v45 = vshrl.u32 %v2483_v51, %v1831_v46  ;;  %v1846_v15 = vshrl.u32 %v2485_v57, %v1831_v46 }
 0x206   : > { %v3762_v53 = vshrl.u32 %v1760_v18, 30  ;;  %v1835_v32 = vor.u32 %v1834_v33, %v1833_v63  ;;  %v1838_v43 = vor.u32 %v1837_v8, %v1836_v3  ;;  %v1844_v39 = vor.u32 %v1843_v4, %v1842_v49 }
 0x207   : > { %v1637_v25 = vmul.f32 %v1636_v6, %v1634_v5  ;;  %v1644_v58 = vmul.f32 %v1643_v21, %v1634_v5  ;;  %v1845_v55 = vshll.u32 %v2484_v54, %v1830_v37  ;;  %v2291_v36 = vadd.s32 4294967169, %v1975_v11 }
 0x208   : > { %v1762_v59 = vshll.u32 %v3762_v53, 30  ;;  %vm1653_vm10 = vcmp.eq.s32.totalorder %v3749_v17, 0  ;;  %v1841_v23 = vor.u32 %v1840_v45, %v1839_v62  ;;  %vm1848_vm11 = vcmp.lt.s32.totalorder %v3757_v20, 1 }
 0x209   : > { %v1638_v14 = vadd.f32 -0.4999988, %v1637_v25  ;;  %v1645_v41 = vadd.f32 -0.16666654, %v1644_v58  ;;  %v1847_v12 = vor.u32 %v1846_v15, %v1845_v55  ;;  %vm1851_vm12 = vcmp.lt.s32.totalorder %v3757_v20, 4 }
 0x20a   : > { %v3773_v9 = vsub.s32 %v1759_v29, %v1762_v59  ;;  %vm1652_vm13 = vcmp.lt.s32.totalorder %v3749_v17, 2  ;;  %vm1649_vm15 = vweird.f32 %v3404_v52  ;;  %vm1663_vm0 = vcmp.lt.s32.totalorder %v3527_v13, 0 }
 0x20b   : > { %v1639_v24 = vmul.f32 %v1638_v14, %v1634_v5  ;;  %v1646_v7 = vmul.f32 %v1645_v41, %v1634_v5  ;;  %v1832_v28 = vshrl.u32 %v2480_v42, %v1831_v46  ;;  %vm1849_vm1 = vcmp.lt.s32.totalorder %v3757_v20, 2 }
 0x20c   : > { %vm1764_vm14 = vcmp.lt.s32.totalorder %v3773_v9, 0  ;;  %v1765_v56 = vsub.s32 0, %v3773_v9  ;;  %v1856_v60 = vsel %vm1848_vm11, %v1835_v32, %v1838_v43  ;;  %v1857_v61 = vsel %vm1851_vm12, %v1844_v39, 920167782 }
 0x20d   : > { %v1640_v27 = vadd.f32 1.0, %v1639_v24  ;;  %v1647_v0 = vadd.f32 1.0, %v1646_v7  ;;  %vm1850_vm2 = vcmp.lt.s32.totalorder %v3757_v20, 3  ;;  %v1853_v26 = vsel %vm1851_vm12, %v1841_v23, 2102212464 }
 0x20e   : > { %v1766_v50 = vsel %vm1764_vm14, %v1765_v56, %v3773_v9  ;;  %v1858_v1 = vsel %vm1850_vm2, %v1841_v23, %v1857_v61  ;;  %v1860_v5 = vsel %vm1848_vm11, %v1838_v43, %v1841_v23  ;;  %v1861_v34 = vsel %vm1851_vm12, %v1847_v12, 1326507024 }
 0x20f   : > { %v1767_v37 = vclz %v1766_v50  ;;  %v1648_v29 = vmul.f32 %v1647_v0, %v3745_v35  ;;  %v1657_v46 = vxor.u32 2147483648, %v1640_v27  ;;  %v1859_v19 = vsel %vm1849_vm1, %v1856_v60, %v1858_v1 }
 0x210   : > { %v1785_v11 = vsub.s32 4, %v3762_v53  ;;  %v1866_v33 = vshrl.u32 %v3736_v38, 16  ;;  %v1981_v8 = vadd.s32 1, %v2291_v36  ;;  %v1852_v6 = vsel %vm1848_vm11, %v1832_v28, %v1835_v32 }
 0x211   : > { %v2286_v18 = vadd.s32 4294967294, %v1767_v37  ;;  %v1654_v4 = vxor.u32 2147483648, %v1648_v29  ;;  %v1854_v35 = vsel %vm1850_vm2, %v1838_v43, %v1853_v26  ;;  %v1862_v21 = vsel %vm1850_vm2, %v1844_v39, %v1861_v34 }
 0x212   : > { %v1658_v63 = vsel %vm1656_vm9, %v1657_v46, %v1648_v29  ;;  %v1863_v3 = vsel %vm1849_vm1, %v1860_v5, %v1862_v21  ;;  %v1889_v45 = vand.u32 65535, %v1859_v19  ;;  %v1890_v43 = vshrl.u32 %v1859_v19, 16 }
 0x213   : > { %vm2287_vm3 = vcmp.lt.s32.totalorder %v2286_v18, 0  ;;  %v1655_v49 = vsel %vm1653_vm10, %v1640_v27, %v1654_v4  ;;  %v1867_v25 = vand.u32 65535, %v1863_v3  ;;  %v1868_v58 = vshrl.u32 %v1863_v3, 16 }
 0x214   : > { %v1770_v15 = vsel %vm2287_vm3, 0, %v2286_v18  ;;  %v1659_v59 = vsel %vm1652_vm13, %v1655_v49, %v1658_v63  ;;  %v3823_v55 = vsel %vm1663_vm0, %v1785_v11, %v3762_v53  ;;  %vm3828_vm4 = vcmp.le.f32.partialorder %v1661_v30, 0.7853982 }
 0x215   : > { %v1771_v62 = vsub.s32 32, %v1770_v15  ;;  %v1775_v32 = vsub.s32 4294967266, %v1770_v15  ;;  %v1660_v39 = vsel %vm1649_vm15, nan, %v1659_v59  ;;  %v1870_v14 = vmul.u32 %v1868_v58, %v3754_v10 }
 0x216   : > { %v1871_v41 = vmul.u32 %v1867_v25, %v1866_v33  ;;  %v1772_v17 = vshll.u32 %v3773_v9, %v1770_v15  ;;  %v3836_v12 = vsel %vm1849_vm1, %v1852_v6, %v1854_v35  ;;  %2126 = vst [vmem:[#allocation2 + $0x28] sm:$0xff] %v1660_v39  ;;  %v1869_v53 = vmul.u32 %v1867_v25, %v3754_v10 }
 0x217   : > { %v1773_v23 = vshrl.u32 %v3751_v40, %v1771_v62  ;;  %v1776_v52 = vadd.s32 127, %v1775_v32  ;;  %v1872_v24 = vmul.u32 %v1868_v58, %v1866_v33  ;;  %v1873_v7 = vshll.u32 %v1870_v14, 16 }
 0x218   : > { %v1891_v56 = vmul.u32 %v1889_v45, %v3754_v10  ;;  %v1892_v60 = vmul.u32 %v1890_v43, %v3754_v10  ;;  %v1893_v61 = vmul.u32 %v1889_v45, %v1866_v33  ;;  %v1874_v9 = vshrl.u32 %v1870_v14, 16 }
 0x219   : > { %v1774_v30 = vor.u32 %v1773_v23, %v1772_v17  ;;  %v1777_v28 = vshll.u32 %v1776_v52, 23  ;;  %v1875_v27 = vshll.u32 %v1871_v41, 16  ;;  %vm1877_vm5 = vc.u32 %v1869_v53, %v1873_v7 }
 0x21a   : > { %v1879_v40 = vadd.s32 %v1873_v7, %v1869_v53  ;;  %v1878_v20 = vsel %vm1877_vm5, 1, %v2479_v2  ;;  %v1895_v50 = vshll.u32 %v1892_v60, 16  ;;  %vm1982_vm6 = vcmp.gt.s32.totalorder %v1981_v8, 0 }
 0x21b   : > { %v1778_v0 = vor.u32 4788187, %v1777_v28  ;;  %v1781_v37 = vcvt.s32.f32 %v1774_v30  ;;  %v1880_v26 = vadd.s32 %v1878_v20, %v1872_v24  ;;  %v1894_v1 = vmul.u32 %v1890_v43, %v1866_v33 }
 0x21c   : > { %vm1881_vm7 = vc.u32 %v1879_v40, %v1875_v27  ;;  %v1897_v46 = vshll.u32 %v1893_v61, 16  ;;  %vm1899_vm8 = vc.u32 %v1891_v56, %v1895_v50  ;;  %v1901_v34 = vadd.s32 %v1895_v50, %v1891_v56 }
 0x21d   : > { %v1779_v5 = vand.u32 2147483647, %v1778_v0  ;;  %v1882_v29 = vsel %vm1881_vm7, 1, %v2479_v2  ;;  %v1900_v19 = vsel %vm1899_vm8, 1, %v2479_v2  ;;  %v1983_v18 = vsel %vm1982_vm6, %v1981_v8, 0 }
 0x21e   : > { %v1884_v10 = vadd.s32 %v1882_v29, %v1880_v26  ;;  %v1902_v4 = vadd.s32 %v1900_v19, %v1894_v1  ;;  %v1978_v6 = vand.u32 8388607, %v1971_v31  ;;  %v1985_v35 = vand.u32 31, %v1983_v18 }
 0x21f   : > { %v1782_v11 = vmul.f32 %v1781_v37, %v1779_v5  ;;  %v1788_v33 = vsel %vm3828_vm4, 0, %v3823_v55  ;;  %v1876_v21 = vshrl.u32 %v1871_v41, 16  ;;  %vm1903_vm9 = vc.u32 %v1901_v34, %v1897_v46 }
 0x220   : > { %v1885_v63 = vadd.s32 %v1884_v10, %v1874_v9  ;;  %v1904_v45 = vsel %vm1903_vm9, 1, %v2479_v2  ;;  %v1909_v49 = vmul.u32 %v3736_v38, %v3836_v12  ;;  %v3852_v8 = vsub.s32 32, %v1985_v35 }
 0x221   : > { %v1783_v3 = vxor.u32 2147483648, %v1782_v11  ;;  %v1896_v25 = vshrl.u32 %v1892_v60, 16  ;;  %v1898_v58 = vshrl.u32 %v1893_v61, 16  ;;  %v1906_v59 = vadd.s32 %v1904_v45, %v1902_v4 }
 0x222   : > { %v3854_v15 = vadd.s32 %v1885_v63, %v1876_v21  ;;  %v3858_v32 = vadd.s32 %v1901_v34, %v1897_v46  ;;  %v3860_v43 = vshrl.u32 %v1983_v18, 5  ;;  %v1988_v39 = vshll.u32 %v2480_v42, %v1985_v35 }
 0x223   : > { %v1784_v62 = vsel %vm1663_vm0, %v1783_v3, %v1782_v11  ;;  %v1907_v55 = vadd.s32 %v1906_v59, %v1896_v25  ;;  %v1989_v14 = vshrl.u32 %v2481_v44, %v3852_v8  ;;  %v1992_v41 = vshrl.u32 %v2482_v48, %v3852_v8 }
 0x224   : > { %v1787_v38 = vsel %vm3828_vm4, %v3527_v13, %v1784_v62  ;;  %v1991_v23 = vshll.u32 %v2481_v44, %v1985_v35  ;;  %v1994_v52 = vshll.u32 %v2482_v48, %v1985_v35  ;;  %v1995_v12 = vshrl.u32 %v2483_v51, %v3852_v8 }
 0x225   : > { %v1789_v17 = vmul.f32 %v1787_v38, %v1787_v38  ;;  %v1908_v53 = vadd.s32 %v1907_v55, %v1898_v58  ;;  %vm1911_vm10 = vc.u32 %v3854_v15, %v3858_v32  ;;  %v1997_v36 = vshll.u32 %v2483_v51, %v1985_v35 }
 0x226   : > { %v1998_v24 = vshrl.u32 %v2484_v54, %v3852_v8  ;;  %v2000_v30 = vshll.u32 %v2484_v54, %v1985_v35  ;;  %v2001_v44 = vshrl.u32 %v2485_v57, %v3852_v8  ;;  %v3882_v28 = vor.u32 %v1989_v14, %v1988_v39 }
 0x227   : > { %v1790_v7 = vmul.f32 -0.001358992, %v1789_v17  ;;  %v1797_v56 = vmul.f32 -0.00019511016, %v1789_v17  ;;  %v1912_v48 = vadd.s32 1, %v1908_v53  ;;  %v3884_v60 = vor.u32 %v1992_v41, %v1991_v23 }
 0x228   : > { %v1999_v61 = vor.u32 %v1998_v24, %v1997_v36  ;;  %v3886_v40 = vor.u32 %v1995_v12, %v1994_v52  ;;  %v2002_v51 = vor.u32 %v2001_v44, %v2000_v30  ;;  %v1805_v0 = vadd.s32 3, %v1788_v33 }
 0x229   : > { %v1791_v9 = vadd.f32 0.041655596, %v1790_v7  ;;  %v1798_v27 = vadd.f32 0.008332121, %v1797_v56  ;;  %v1913_v20 = vsel %vm1911_vm10, %v1912_v48, %v1908_v53  ;;  %v1979_v54 = vor.u32 8388608, %v1978_v6 }
 0x22a   : > { %vm2003_vm11 = vcmp.lt.s32.totalorder %v3860_v43, 1  ;;  %v1914_v37 = vadd.s32 %v1913_v20, %v1909_v49  ;;  %vm2006_vm12 = vcmp.lt.s32.totalorder %v3860_v43, 4  ;;  %vm2005_vm13 = vcmp.lt.s32.totalorder %v3860_v43, 3 }
 0x22b   : > { %v1792_v57 = vmul.f32 %v1791_v9, %v1789_v17  ;;  %v1799_v50 = vmul.f32 %v1798_v27, %v1789_v17  ;;  %v2011_v26 = vsel %vm2003_vm11, %v3882_v28, %v3884_v60  ;;  %v2012_v1 = vsel %vm2006_vm12, %v1999_v61, 920167782 }
 0x22c   : > { %v2016_v5 = vsel %vm2006_vm12, %v2002_v51, 1326507024  ;;  %v1915_v10 = vadd.s32 536870912, %v1914_v37  ;;  %v2015_v19 = vsel %vm2003_vm11, %v3884_v60, %v3886_v40  ;;  %v2013_v34 = vsel %vm2005_vm13, %v3886_v40, %v2012_v1 }
 0x22d   : > { %v1793_v29 = vadd.f32 -0.4999988, %v1792_v57  ;;  %v1800_v46 = vadd.f32 -0.16666654, %v1799_v50  ;;  %v2017_v18 = vsel %vm2005_vm13, %v1999_v61, %v2016_v5  ;;  %v3911_v11 = vshll.u32 %v1979_v54, 8 }
 0x22e   : > { %v3913_v35 = vshrl.u32 %v1915_v10, 30  ;;  %vm2004_vm14 = vcmp.lt.s32.totalorder %v3860_v43, 2  ;;  %v1806_v33 = vand.u32 3, %v1805_v0  ;;  %vm1804_vm15 = vweird.f32 %v3527_v13 }
 0x22f   : > { %v1794_v4 = vmul.f32 %v1793_v29, %v1789_v17  ;;  %v1801_v6 = vmul.f32 %v1800_v46, %v1789_v17  ;;  %v2014_v21 = vsel %vm2004_vm14, %v2011_v26, %v2013_v34  ;;  %v2018_v63 = vsel %vm2004_vm14, %v2015_v19, %v2017_v18 }
 0x230   : > { %v1917_v49 = vshll.u32 %v3913_v35, 30  ;;  %v2020_v25 = vand.u32 65535, %v3911_v11  ;;  %v2021_v58 = vshrl.u32 %v3911_v11, 16  ;;  %v2022_v59 = vand.u32 65535, %v2018_v63 }
 0x231   : > { %v1795_v3 = vadd.f32 1.0, %v1794_v4  ;;  %v1802_v45 = vadd.f32 1.0, %v1801_v6  ;;  %v2023_v62 = vshrl.u32 %v2018_v63, 16  ;;  %v2045_v41 = vshrl.u32 %v2014_v21, 16 }
 0x232   : > { %v1918_v14 = vsub.s32 %v1914_v37, %v1917_v49  ;;  %vm1807_vm0 = vcmp.lt.s32.totalorder %v1806_v33, 2  ;;  %vm1808_vm1 = vcmp.eq.s32.totalorder %v1806_v33, 0  ;;  %v2026_v12 = vmul.u32 %v2022_v59, %v2021_v58 }
 0x233   : > { %v1803_v39 = vmul.f32 %v1802_v45, %v1787_v38  ;;  %v1812_v55 = vxor.u32 2147483648, %v1795_v3  ;;  %v2025_v17 = vmul.u32 %v2023_v62, %v2020_v25  ;;  %vm1811_vm3 = vcmp.eq.s32.totalorder %v1806_v33, 2 }
 0x234   : > { %vm1919_vm2 = vcmp.lt.s32.totalorder %v1918_v14, 0  ;;  %v1920_v52 = vsub.s32 0, %v1918_v14  ;;  %v2024_v53 = vmul.u32 %v2022_v59, %v2020_v25  ;;  %v2044_v24 = vand.u32 65535, %v2014_v21 }
 0x235   : > { %v1809_v23 = vxor.u32 2147483648, %v1803_v39  ;;  %v2028_v36 = vshll.u32 %v2025_v17, 16  ;;  %v1813_v56 = vsel %vm1811_vm3, %v1812_v55, %v1803_v39  ;;  %v2047_v38 = vmul.u32 %v2045_v41, %v2020_v25 }
 0x236   : > { %v1921_v30 = vsel %vm1919_vm2, %v1920_v52, %v1918_v14  ;;  %v2027_v61 = vmul.u32 %v2023_v62, %v2021_v58  ;;  %v2030_v27 = vshll.u32 %v2026_v12, 16  ;;  %v2046_v54 = vmul.u32 %v2044_v24, %v2020_v25 }
 0x237   : > { %v1810_v7 = vsel %vm1808_vm1, %v1795_v3, %v1809_v23  ;;  %v1922_v48 = vclz %v1921_v30  ;;  %vm2032_vm4 = vc.u32 %v2024_v53, %v2028_v36  ;;  %v2034_v0 = vadd.s32 %v2028_v36, %v2024_v53 }
 0x238   : > { %v1814_v44 = vsel %vm1807_vm0, %v1810_v7, %v1813_v56  ;;  %v2033_v51 = vsel %vm2032_vm4, 1, %v2479_v2  ;;  %v2048_v50 = vmul.u32 %v2044_v24, %v2021_v58  ;;  %v2050_v37 = vshll.u32 %v2047_v38, 16 }
 0x239   : > { %v1815_v9 = vsel %vm1804_vm15, nan, %v1814_v44  ;;  %v2289_v20 = vadd.s32 4294967294, %v1922_v48  ;;  %v2035_v57 = vadd.s32 %v2033_v51, %v2027_v61  ;;  %vm2036_vm5 = vc.u32 %v2034_v0, %v2030_v27 }
 0x23a   : > { %2127 = vst [vmem:[#allocation2 + $0x48] sm:$0xff] %v1815_v9  ;;  %v1910_v26 = vadd.s32 %v3858_v32, %v3854_v15  ;;  %v2037_v1 = vsel %vm2036_vm5, 1, %v2479_v2  ;;  %v2049_v29 = vmul.u32 %v2045_v41, %v2021_v58  ;;  %vm2054_vm7 = vc.u32 %v2046_v54, %v2050_v37 }
 0x23b   : > { %vm2290_vm6 = vcmp.lt.s32.totalorder %v2289_v20, 0  ;;  %v2039_v13 = vadd.s32 %v2037_v1, %v2035_v57  ;;  %v2029_v19 = vshrl.u32 %v2025_v17, 16  ;;  %v2055_v34 = vsel %vm2054_vm7, 1, %v2479_v2 }
 0x23c   : > { %v1925_v5 = vsel %vm2290_vm6, 0, %v2289_v20  ;;  %v2052_v18 = vshll.u32 %v2048_v50, 16  ;;  %v2056_v4 = vadd.s32 %v2050_v37, %v2046_v54  ;;  %v2057_v6 = vadd.s32 %v2055_v34, %v2049_v29 }
 0x23d   : > { %v1926_v46 = vsub.s32 32, %v1925_v5  ;;  %v1930_v10 = vsub.s32 4294967266, %v1925_v5  ;;  %v1927_v33 = vshll.u32 %v1918_v14, %v1925_v5  ;;  %v2040_v3 = vadd.s32 %v2039_v13, %v2029_v19 }
 0x23e   : > { %v1987_v15 = vshrl.u32 %v2480_v42, %v3852_v8  ;;  %v2008_v32 = vsel %vm2006_vm12, %v3886_v40, 2102212464  ;;  %vm2058_vm8 = vc.u32 %v2056_v4, %v2052_v18  ;;  %v2031_v25 = vshrl.u32 %v2026_v12, 16 }
 0x23f   : > { %v1928_v21 = vshrl.u32 %v1910_v26, %v1926_v46  ;;  %v1931_v63 = vadd.s32 127, %v1930_v10  ;;  %v2059_v58 = vsel %vm2058_vm8, 1, %v2479_v2  ;;  %v2051_v59 = vshrl.u32 %v2047_v38, 16 }
 0x240   : > { %v2061_v62 = vadd.s32 %v2059_v58, %v2057_v6  ;;  %v2007_v55 = vsel %vm2003_vm11, %v1987_v15, %v3882_v28  ;;  %v2009_v42 = vsel %vm2005_vm13, %v3884_v60, %v2008_v32  ;;  %v2041_v8 = vadd.s32 %v2040_v3, %v2031_v25 }
 0x241   : > { %v1929_v45 = vor.u32 %v1928_v21, %v1927_v33  ;;  %v1932_v49 = vshll.u32 %v1931_v63, 23  ;;  %v2053_v14 = vshrl.u32 %v2048_v50, 16  ;;  %v2060_v23 = vadd.s32 %v2056_v4, %v2052_v18 }
 0x242   : > { %v2062_v40 = vadd.s32 %v2061_v62, %v2051_v59  ;;  %v2010_v2 = vsel %vm2004_vm14, %v2007_v55, %v2009_v42  ;;  %vm1818_vm10 = vcmp.lt.s32.totalorder %v3687_v47, 0  ;;  %v1940_v60 = vsub.s32 4, %v3913_v35 }
 0x243   : > { %v1933_v39 = vor.u32 4788187, %v1932_v49  ;;  %v1936_v17 = vcvt.s32.f32 %v1929_v45  ;;  %vm2066_vm9 = vc.u32 %v2041_v8, %v2060_v23  ;;  %v2064_v28 = vmul.u32 %v3911_v11, %v2010_v2 }
 0x244   : > { %v2063_v52 = vadd.s32 %v2062_v40, %v2053_v14  ;;  %vm3950_vm11 = vcmp.le.f32.partialorder %v1816_v22, 0.7853982  ;;  %v1941_v11 = vsel %vm1818_vm10, %v1940_v60, %v3913_v35  ;;  %v2065_v21 = vadd.s32 %v2060_v23, %v2041_v8 }
 0x245   : > { %v1934_v41 = vand.u32 2147483647, %v1933_v39  ;;  %v1943_v27 = vsel %vm3950_vm11, 0, %v1941_v11  ;;  %vm1959_vm0 = vweird.f32 %v3687_v47  ;;  %vm1973_vm2 = vcmp.lt.s32.totalorder %v3690_v16, 0 }
 0x246   : > { %v2067_v53 = vadd.s32 1, %v2063_v52  ;;  %v1960_v50 = vadd.s32 3, %v1943_v27  ;;  %vm1972_vm3 = vcmp.le.f32.partialorder %v1971_v31, 0.7853982  ;;  %vm2114_vm7 = vweird.f32 %v3690_v16 }
 0x247   : > { %v1937_v12 = vmul.f32 %v1936_v17, %v1934_v41 }
 0x248   : > { %v2068_v24 = vsel %vm2066_vm9, %v2067_v53, %v2063_v52  ;;  %v1961_v19 = vand.u32 3, %v1960_v50 }
 0x249   : > { %v1938_v36 = vxor.u32 2147483648, %v1937_v12  ;;  %v2069_v56 = vadd.s32 %v2068_v24, %v2064_v28 }
 0x24a   : > { %vm1963_vm14 = vcmp.eq.s32.totalorder %v1961_v19, 0  ;;  %vm1966_vm15 = vcmp.eq.s32.totalorder %v1961_v19, 2  ;;  %vm1962_vm1 = vcmp.lt.s32.totalorder %v1961_v19, 2 }
 0x24b   : > { %v1939_v43 = vsel %vm1818_vm10, %v1938_v36, %v1937_v12  ;;  %v2070_v44 = vadd.s32 536870912, %v2069_v56 }
 0x24c   : > { %v1942_v30 = vsel %vm3950_vm11, %v3687_v47, %v1939_v43 }
 0x24d   : > { %v1944_v38 = vmul.f32 %v1942_v30, %v1942_v30  ;;  %v2071_v9 = vshrl.u32 %v2070_v44, 30 }
 0x24f   : > { %v1945_v48 = vmul.f32 -0.001358992, %v1944_v38  ;;  %v1952_v61 = vmul.f32 -0.00019511016, %v1944_v38  ;;  %v2072_v0 = vshll.u32 %v2071_v9, 30  ;;  %v2095_v41 = vsub.s32 4, %v2071_v9 }
 0x251   : > { %v1946_v22 = vadd.f32 0.041655596, %v1945_v48  ;;  %v1953_v51 = vadd.f32 0.008332121, %v1952_v61  ;;  %v2073_v57 = vsub.s32 %v2069_v56, %v2072_v0  ;;  %v2096_v12 = vsel %vm1973_vm2, %v2095_v41, %v2071_v9 }
 0x252   : > { %v2098_v28 = vsel %vm1972_vm3, 0, %v2096_v12 }
 0x253   : > { %v1947_v20 = vmul.f32 %v1946_v22, %v1944_v38  ;;  %v1954_v54 = vmul.f32 %v1953_v51, %v1944_v38  ;;  %vm2074_vm12 = vcmp.lt.s32.totalorder %v2073_v57, 0  ;;  %v2075_v1 = vsub.s32 0, %v2073_v57 }
 0x254   : > { %v2115_v56 = vadd.s32 3, %v2098_v28 }
 0x255   : > { %v1948_v37 = vadd.f32 -0.4999988, %v1947_v20  ;;  %v1955_v26 = vadd.f32 -0.16666654, %v1954_v54  ;;  %v2076_v35 = vsel %vm2074_vm12, %v2075_v1, %v2073_v57 }
 0x256   : > { %v2077_v29 = vclz %v2076_v35  ;;  %v2116_v11 = vand.u32 3, %v2115_v56 }
 0x257   : > { %v1949_v5 = vmul.f32 %v1948_v37, %v1944_v38  ;;  %v1956_v13 = vmul.f32 %v1955_v26, %v1944_v38 }
 0x258   : > { %v2292_v34 = vadd.s32 4294967294, %v2077_v29  ;;  %vm2118_vm4 = vcmp.eq.s32.totalorder %v2116_v11, 0  ;;  %vm2121_vm5 = vcmp.eq.s32.totalorder %v2116_v11, 2  ;;  %vm2117_vm6 = vcmp.lt.s32.totalorder %v2116_v11, 2 }
 0x259   : > { %v1950_v46 = vadd.f32 1.0, %v1949_v5  ;;  %v1957_v10 = vadd.f32 1.0, %v1956_v13 }
 0x25a   : > { %vm2293_vm13 = vcmp.lt.s32.totalorder %v2292_v34, 0 }
 0x25b   : > { %v1958_v18 = vmul.f32 %v1957_v10, %v1942_v30  ;;  %v1967_v4 = vxor.u32 2147483648, %v1950_v46  ;;  %v2080_v33 = vsel %vm2293_vm13, 0, %v2292_v34 }
 0x25c   : > { %v2081_v63 = vsub.s32 32, %v2080_v33  ;;  %v2085_v3 = vsub.s32 4294967266, %v2080_v33  ;;  %v2082_v49 = vshll.u32 %v2073_v57, %v2080_v33 }
 0x25d   : > { %v1964_v6 = vxor.u32 2147483648, %v1958_v18  ;;  %v1968_v32 = vsel %vm1966_vm15, %v1967_v4, %v1958_v18 }
 0x25e   : > { %v2083_v25 = vshrl.u32 %v2065_v21, %v2081_v63  ;;  %v2086_v58 = vadd.s32 127, %v2085_v3 }
 0x25f   : > { %v1965_v15 = vsel %vm1963_vm14, %v1950_v46, %v1964_v6 }
 0x260   : > { %v1969_v45 = vsel %vm1962_vm1, %v1965_v15, %v1968_v32  ;;  %v2084_v62 = vor.u32 %v2083_v25, %v2082_v49  ;;  %v2087_v39 = vshll.u32 %v2086_v58, 23 }
 0x261   : > { %v1970_v59 = vsel %vm1959_vm0, nan, %v1969_v45 }
 0x262   : > { %2128 = vst [vmem:[#allocation2 + $0x10] sm:$0xff] %v1970_v59  ;;  %v2088_v55 = vor.u32 4788187, %v2087_v39  ;;  %v2091_v14 = vcvt.s32.f32 %v2084_v62 }
 0x264   : > { %v2089_v42 = vand.u32 2147483647, %v2088_v55 }
 0x266   : > { %v2092_v40 = vmul.f32 %v2091_v14, %v2089_v42 }
 0x268   : > { %v2093_v8 = vxor.u32 2147483648, %v2092_v40 }
 0x26a   : > { %v2094_v47 = vsel %vm1973_vm2, %v2093_v8, %v2092_v40 }
 0x26b   : > { %v2097_v17 = vsel %vm1972_vm3, %v3690_v16, %v2094_v47 }
 0x26c   : > { %v2099_v23 = vmul.f32 %v2097_v17, %v2097_v17 }
 0x26e   : > { %v2100_v2 = vmul.f32 -0.001358992, %v2099_v23  ;;  %v2107_v52 = vmul.f32 -0.00019511016, %v2099_v23 }
 0x270   : > { %v2101_v53 = vadd.f32 0.041655596, %v2100_v2  ;;  %v2108_v36 = vadd.f32 0.008332121, %v2107_v52 }
 0x272   : > { %v2102_v60 = vmul.f32 %v2101_v53, %v2099_v23  ;;  %v2109_v24 = vmul.f32 %v2108_v36, %v2099_v23 }
 0x274   : > { %v2103_v7 = vadd.f32 -0.4999988, %v2102_v60  ;;  %v2110_v43 = vadd.f32 -0.16666654, %v2109_v24 }
 0x276   : > { %v2104_v30 = vmul.f32 %v2103_v7, %v2099_v23  ;;  %v2111_v38 = vmul.f32 %v2110_v43, %v2099_v23 }
 0x278   : > { %v2105_v44 = vadd.f32 1.0, %v2104_v30  ;;  %v2112_v31 = vadd.f32 1.0, %v2111_v38 }
 0x27a   : > { %v2113_v48 = vmul.f32 %v2112_v31, %v2097_v17  ;;  %v2122_v61 = vxor.u32 2147483648, %v2105_v44 }
 0x27c   : > { %v2119_v27 = vxor.u32 2147483648, %v2113_v48  ;;  %v2123_v22 = vsel %vm2121_vm5, %v2122_v61, %v2113_v48 }
 0x27e   : > { %v2120_v9 = vsel %vm2118_vm4, %v2105_v44, %v2119_v27 }
 0x27f   : > { %v2124_v51 = vsel %vm2117_vm6, %v2120_v9, %v2123_v22 }
 0x280   : > { %v2125_v0 = vsel %vm2114_vm7, nan, %v2124_v51 }
 0x281   : > { %2129 = vst [vmem:[#allocation2 + $0x40] sm:$0xff] %v2125_v0 }
 0x282 PF: > { %v2130_v20 = vld [vmem:[#allocation2 + $0x30] sm:$0xff]  ;;  %v2131_v54 = vld [vmem:[#allocation2] sm:$0xff]  ;;  %v2132_v57 = vld [vmem:[#allocation2 + $0x58] sm:$0xff]  ;;  %s2299_s8 = smul.u32 24, %s2461_s15  ;;  %s2169_s15 = sshll.u32 %s2593_s20, 4  ;;  %s2170_s15 = int_to_ptr.vmem [resolvable:$true] %s2169_s15 }
 0x283   : > { %2142 = vst [vmem:[%s2593_s20] sm:$0xff] %v2130_v20  ;;  %v2133_v16 = vld [vmem:[#allocation2 + $0x18] sm:$0xff]  ;;  %v2134_v50 = vld [vmem:[#allocation2 + $0x50] sm:$0xff]  ;;  %v2135_v37 = vld [vmem:[#allocation2 + $0x20] sm:$0xff]  ;;  %s2155_s24 = scalar_lea.sflag [#allocation4], %s176_s4  ;;  %s2403_s7 = scalar_lea.hbm %s4027_s3, 384 }
 0x284   : > { %2143 = vst [vmem:[%s2593_s20 + $0x8] sm:$0xff] %v2131_v54  ;;  %s2166_s9 = sadd.s32 %s2299_s8, %s2582_s5  ;;  %v2136_v26 = vld [vmem:[#allocation2 + $0x8] sm:$0xff]  ;;  %v2137_v1 = vld [vmem:[#allocation2 + $0x38] sm:$0xff]  ;;  %v2140_v35 = vld [vmem:[#allocation2 + $0x10] sm:$0xff] }
 0x285   : > { %2144 = vst [vmem:[%s2593_s20 + $0x10] sm:$0xff] %v2132_v57  ;;  %s2295_s10 = sshll.u32 %s2166_s9, 3  ;;  %v2138_v5 = vld [vmem:[#allocation2 + $0x28] sm:$0xff] }
 0x286   : > { %2145 = vst [vmem:[%s2593_s20 + $0x18] sm:$0xff] %v2133_v16  ;;  %s2168_s16 = scalar_lea.hbm %s4027_s3, %s2295_s10  ;;  %v2139_v13 = vld [vmem:[#allocation2 + $0x48] sm:$0xff] }
 0x287   : > { %2146 = vst [vmem:[%s2593_s20 + $0x20] sm:$0xff] %v2134_v50  ;;  %s2171_s5 = sshll.u32 %s2168_s16, 4  ;;  %s2172_s5 = int_to_ptr.hbm [resolvable:$true] %s2171_s5 }
 0x288   : > { %2147 = vst [vmem:[%s2593_s20 + $0x28] sm:$0xff] %v2135_v37  ;;  %v2141_v29 = vld [vmem:[#allocation2 + $0x40] sm:$0xff]  ;;  %s2397_s27 = sshra.s32 %s2172_s5, 4  ;;  %s2398_s27 = int_to_ptr.hbm [resolvable:$true] %s2397_s27 }
 0x289   : > { %2148 = vst [vmem:[%s2593_s20 + $0x30] sm:$0xff] %v2136_v26  ;;  %s2399_s28 = scalar_lea.hbm %s2398_s27, 96  ;;  %p2404_p4 = scmp.lt.s32.totalorder %s2398_s27, %s4027_s3 }
 0x28a   : > { %2149 = vst [vmem:[%s2593_s20 + $0x38] sm:$0xff] %v2137_v1  ;;  %p2400_p0 = scmp.ne.s32.totalorder %s2398_s27, %s2399_s28  ;;  %p2405_p5 = scmp.lt.s32.totalorder %s2403_s7, %s2399_s28 }
 0x28b   : > { %2150 = vst [vmem:[%s2593_s20 + $0x40] sm:$0xff] %v2138_v5 }
 0x28c   : > { %2151 = vst [vmem:[%s2593_s20 + $0x48] sm:$0xff] %v2139_v13  ;;  %p2401_p1 = pnand %p2400_p0, %p2560_p3  ;;  %p2406_p6 = por %p2405_p5, %p2404_p4 }
 0x28d   : > { %2152 = vst [vmem:[%s2593_s20 + $0x50] sm:$0xff] %v2140_v35 }
 0x28e   : > { %2153 = vst [vmem:[%s2593_s20 + $0x58] sm:$0xff] %v2141_v29  ;;  %p2402_p2 = pneg %p2401_p1 }
 0x290   : > { %p2407_p7 = pnand %p2406_p6, %p2402_p2 }
 0x292   : > { %2410 = shalt.err (!%p2407_p7)
}
 0x293   : > { %s2486_s4 = smov 256   ;;  %s2487_s20 = smov 512  }
 0x294   : > { %s2488_s10 = smov 16  }
 0x295   : > { %2300 = dma.vmem_to_hbm [thread:$0]  (%p2560_p3), %s2170_s15, 1536, %s2172_s5, %s2155_s24, %s2486_s4, %s2487_s20, %s2488_s10  }
 0x296 PF: > { %p2306_p9 = scmp.ge.s32.totalorder %s2477_s19, 2  ;;  %s2186_s11 = sand.u32 1, %s2449_s12  }
 0x297   : > { %s2187_s21 = scalar_lea.sflag [#allocation4], %s2186_s11 }
 0x298   : > { %p2303_p10 = pnand %p2306_p9, %p2569_p8 }
 0x29a   : > { %p2304_p11 = pneg %p2303_p10 }
 0x29c   : > { %2444 = dma.done.wait (%p2304_p11), %s2187_s21, 1536  }
 0x29d   : > { %2446 = vsyncadd (%p2304_p11), %s2187_s21, 4294965760  ;;  %s16_s19 = sadd.s32 1, %s2477_s19   ;;  %s4050_s12 = smov %s2453_s13 }
 0x29e   : > { %p13_p12 = scmp.ge.s32.totalorder %s16_s19, 6   ;;  %s4051_s13 = smov %s2457_s14 }
 0x29f   : > { %s4052_s14 = smov %s2578_s30  ;;  %s4053_s15 = smov %s2469_s17 }
 0x2a0   : > { %s4054_s16 = smov %s2473_s18  ;;  %s4055_s17 = smov %s4058_s22 }
 0x2a1   : > { %s4056_s18 = smov %s4062_s23  ;;  %15 = sbr.rel (!%p13_p12) target bundleno = 5 (0x5), region = 73 }
 0x2a6   :  { %2193 = vsyncpa [#allocation4], 1 }
 0x2a7   :  { %2195 = vsyncpa [#allocation4 + $0x1], 1 }

</bundles_post_ra>
